<compile_context>
chip_gen: v5e
topology: v5e:2x2
jax: 0.10.0
libtpu: 0.0.40
codegen_flags: <defaults>
</compile_context>

<pallas_src>
import jax
import jax.numpy as jnp
from jax import lax
from jax.experimental import pallas as pl
from jax.experimental.pallas import tpu as pltpu


def _round_up(x, m):
    return ((x + m - 1) // m) * m


def _biasfree_ln_kernel(x_ref, w_ref, o_ref):
    # x_ref: (tm, C) tile of rows; w_ref: (1, C) weight; o_ref: (tm, C)
    x = x_ref[...].astype(jnp.float32)
    inv_c = jnp.float32(1.0 / x.shape[-1])
    # Fused single pass over the tile: sum and sum-of-squares together.
    s1 = jnp.sum(x, axis=-1, keepdims=True)
    s2 = jnp.sum(x * x, axis=-1, keepdims=True)
    mu = s1 * inv_c
    var = jnp.maximum(s2 * inv_c - mu * mu, 0.0)  # biased variance (unbiased=False)
    inv = lax.rsqrt(var + 1e-5)
    # torch divides x (NOT x - mu) by sqrt(var + eps), then scales by weight
    w = w_ref[...].astype(jnp.float32)
    o_ref[...] = (x * inv * w).astype(o_ref.dtype)


# Scoped-VMEM budget reserved for the pipelined tiles (in + out, double-buffered),
# leaving room for in-kernel f32 temporaries under the explicit limit below.
_TILE_VMEM_BUDGET = 24 * 1024 * 1024
# Explicit scoped-VMEM limit: > default scoped limits on all gens, < v7x 64 MiB physical.
_VMEM_LIMIT_BYTES = 48 * 1024 * 1024
_MAX_TILE_ROWS = 8192


def _choose_tile_rows(M, C, itemsize):
    """Largest row tile that fits the VMEM budget, sublane-aligned, with a sane grid."""
    c_pad = _round_up(C, 128)  # sub-128 C pads to 128 lanes in VMEM
    # (input + output) x (double buffering) per row of the tile
    bytes_per_row = 2 * 2 * c_pad * itemsize
    tm = max(_TILE_VMEM_BUDGET // bytes_per_row, 1)
    tm = min(tm, _MAX_TILE_ROWS, M)
    if tm >= 8:
        tm = (tm // 8) * 8  # sublane alignment (second-minor dim multiple of 8)
    else:
        tm = M  # tiny inputs: block equals full array dim (allowed by the (8,128) rule)
    # Keep the grid at >= 4 steps for big problems (DMA/compute overlap + v7x 2-TC split),
    # but never shrink the tile below 1024 rows for that reason.
    if M >= 4 * 1024:
        tm = min(tm, max(1024, _round_up(pl.cdiv(M, 4), 8)))
    return max(tm, 1)


def biasfree_layernorm(x, weight):
    """x: (..., C) channels-last, weight: (C,). Returns same shape/dtype as x."""
    orig_shape = x.shape
    C = orig_shape[-1]
    assert weight.shape == (C,)

    x2d = x.reshape(-1, C)
    M = x2d.shape[0]
    tm = _choose_tile_rows(M, C, jnp.dtype(x.dtype).itemsize)
    grid = (pl.cdiv(M, tm),)  # partial last block handled by Pallas (per-row math)

    w2d = weight.reshape(1, C)

    out = pl.pallas_call(
        _biasfree_ln_kernel,
        out_shape=jax.ShapeDtypeStruct((M, C), x.dtype),
        grid_spec=pltpu.PrefetchScalarGridSpec(
            num_scalar_prefetch=0,
            grid=grid,
            in_specs=[
                pl.BlockSpec((tm, C), lambda i: (i, 0)),   # rows tiled, full C
                pl.BlockSpec((1, C), lambda i: (0, 0)),    # weight broadcast to all tiles
            ],
            out_specs=pl.BlockSpec((tm, C), lambda i: (i, 0)),
        ),
        compiler_params=pltpu.CompilerParams(
            dimension_semantics=("parallel",),
            vmem_limit_bytes=_VMEM_LIMIT_BYTES,
        ),
    )(x2d, w2d)

    return out.reshape(orig_shape)


def _reference(x, weight):
    # Pure-JAX reference mirroring the torch forward exactly (f32 math).
    xf = x.astype(jnp.float32)
    mu = jnp.mean(xf, axis=-1, keepdims=True)
    sigma = jnp.mean((xf - mu) ** 2, axis=-1, keepdims=True)  # var, unbiased=False
    out = xf / jnp.sqrt(sigma + 1e-5) * weight.astype(jnp.float32)
    return out.astype(x.dtype)


if __name__ == "__main__":
    key = jax.random.PRNGKey(0)

    # Primary check: Restormer-like channels-last view (B, H*W, C), f32.
    B, H, W, C = 2, 16, 16, 48
    x = jax.random.normal(key, (B, H * W, C), dtype=jnp.float32)
    weight = jnp.ones((C,), dtype=jnp.float32)  # nn.Parameter(torch.ones(C))

    out = jax.block_until_ready(biasfree_layernorm(x, weight))
    ref = _reference(x, weight)
    assert out.shape == x.shape and out.dtype == x.dtype
    assert jnp.allclose(out, ref, atol=1e-5, rtol=1e-5), "mismatch vs reference (f32)"

    # Secondary check: row count not a multiple of the tile (partial last block path)
    # and a non-trivial weight.
    key2, key3 = jax.random.split(jax.random.PRNGKey(0))
    x2 = jax.random.normal(key2, (1, 450, 32), dtype=jnp.float32)
    w2 = jax.random.normal(key3, (32,), dtype=jnp.float32)
    out2 = jax.block_until_ready(biasfree_layernorm(x2, w2))
    ref2 = _reference(x2, w2)
    assert jnp.allclose(out2, ref2, atol=1e-5, rtol=1e-5), "mismatch vs reference (ragged M)"

    print("KERNEL_OK")
</pallas_src>

<mosaic_0001>
module attributes {stable_mosaic.version = 11 : i64} {
  func.func @_biasfree_ln_kernel(%arg0: i32, %arg1: memref<512x48xf32, #tpu.memory_space<vmem>>, %arg2: memref<1x48xf32, #tpu.memory_space<vmem>>, %arg3: memref<512x48xf32, #tpu.memory_space<vmem>>) attributes {dimension_semantics = [#tpu.dimension_semantics<parallel>], iteration_bounds = array<i64: 1>, scalar_prefetch = 0 : i64, scratch_operands = 0 : i64, tpu.core_type = #tpu.core_type<tc>, window_params = [{transform_indices = @transform_0, window_bounds = array<i64: 512, 48>}, {pipeline_mode = #tpu.pipeline_mode<synchronous>, transform_indices = @transform_1, window_bounds = array<i64: 1, 48>}, {transform_indices = @transform_2, window_bounds = array<i64: 512, 48>}]} {
    %c0 = arith.constant 0 : index
    %c0_0 = arith.constant 0 : index
    %0 = vector.load %arg1[%c0, %c0_0] : memref<512x48xf32, #tpu.memory_space<vmem>>, vector<512x48xf32>
    %cst = arith.constant dense<0.000000e+00> : vector<512xf32>
    %1 = vector.multi_reduction <add>, %0, %cst [1] : vector<512x48xf32> to vector<512xf32>
    %2 = vector.shape_cast %1 : vector<512xf32> to vector<512x1xf32>
    %3 = arith.mulf %0, %0 : vector<512x48xf32>
    %cst_1 = arith.constant dense<0.000000e+00> : vector<512xf32>
    %4 = vector.multi_reduction <add>, %3, %cst_1 [1] : vector<512x48xf32> to vector<512xf32>
    %5 = vector.shape_cast %4 : vector<512xf32> to vector<512x1xf32>
    %cst_2 = arith.constant 0.020833334 : f32
    %6 = vector.broadcast %cst_2 : f32 to vector<512x1xf32>
    %7 = arith.mulf %2, %6 : vector<512x1xf32>
    %cst_3 = arith.constant 0.020833334 : f32
    %8 = vector.broadcast %cst_3 : f32 to vector<512x1xf32>
    %9 = arith.mulf %5, %8 : vector<512x1xf32>
    %10 = arith.mulf %7, %7 : vector<512x1xf32>
    %11 = arith.subf %9, %10 : vector<512x1xf32>
    %cst_4 = arith.constant 0.000000e+00 : f32
    %12 = vector.broadcast %cst_4 : f32 to vector<512x1xf32>
    %13 = arith.maximumf %11, %12 : vector<512x1xf32>
    %cst_5 = arith.constant 9.99999974E-6 : f32
    %14 = vector.broadcast %cst_5 : f32 to vector<512x1xf32>
    %15 = arith.addf %13, %14 : vector<512x1xf32>
    %16 = math.rsqrt %15 : vector<512x1xf32>
    %c0_6 = arith.constant 0 : index
    %c0_7 = arith.constant 0 : index
    %17 = vector.load %arg2[%c0_6, %c0_7] : memref<1x48xf32, #tpu.memory_space<vmem>>, vector<1x48xf32>
    %18 = vector.broadcast %16 : vector<512x1xf32> to vector<512x48xf32>
    %19 = arith.mulf %0, %18 : vector<512x48xf32>
    %20 = vector.broadcast %17 : vector<1x48xf32> to vector<512x48xf32>
    %21 = arith.mulf %19, %20 : vector<512x48xf32>
    %c0_8 = arith.constant 0 : index
    %c0_9 = arith.constant 0 : index
    %22 = vector.load %arg3[%c0_8, %c0_9] : memref<512x48xf32, #tpu.memory_space<vmem>>, vector<512x48xf32>
    tpu.vector_store %arg3[%c0_8, %c0_9], %21 {strides = array<i32>} : memref<512x48xf32, #tpu.memory_space<vmem>>, vector<512x48xf32>,
    return
  }
  func.func @transform_0(%arg0: i32) -> (i32, i32) {
    %c0_i32 = arith.constant 0 : i32
    %c0_i32_0 = arith.constant 0 : i32
    return %arg0, %c0_i32 : i32, i32
  }
  func.func @transform_1(%arg0: i32) -> (i32, i32) {
    %c0_i32 = arith.constant 0 : i32
    %c0_i32_0 = arith.constant 0 : i32
    %c0_i32_1 = arith.constant 0 : i32
    return %c0_i32, %c0_i32_0 : i32, i32
  }
  func.func @transform_2(%arg0: i32) -> (i32, i32) {
    %c0_i32 = arith.constant 0 : i32
    %c0_i32_0 = arith.constant 0 : i32
    return %arg0, %c0_i32 : i32, i32
  }
}

</mosaic_0001>

<bundles_post_ra>
// kernel: tpu_custom_call.1
= control target key start
LH: loop header
LB: loop body
LE: loop exit
PB: predicated region body
PF: predicated region fallthrough
CT: control target
= control target key end

     0   :  { %vm75_vm0 = vcmask 392192   ;;  %s4454_s0 = inlined_call_operand.vmem [shape: f32[512,48], index: 0, kind: input, shape index: {}]   ;;  %s4455_s1 = inlined_call_operand.vmem [shape: f32[1,48], index: 1, kind: input, shape index: {}]   ;;  %s4456_s2 = inlined_call_operand.vmem [shape: f32[512,48], index: 2, kind: output, shape index: {}]  }
   0x1   :  { %v1966_v0 = vld [vmem:[%s4454_s0 + $0x20] sm:$0xff]  ;;  %v1971_v1 = vld [vmem:[%s4454_s0 + $0x10] sm:$0xff]  ;;  %v1987_v6 = vld [vmem:[%s4454_s0 + $0x28] sm:$0xff] }
   0x2   :  { %v1976_v2 = vld [vmem:[%s4454_s0] sm:$0xff]  ;;  %v88_v3 = vsel %vm75_vm0, %v1966_v0, 0.0  ;;  %v82_v4 = vsel %vm75_vm0, %v1971_v1, 0.0  ;;  %v1992_v7 = vld [vmem:[%s4454_s0 + $0x18] sm:$0xff]  ;;  %v1997_v8 = vld [vmem:[%s4454_s0 + $0x8] sm:$0xff]  ;;  %v91_v9 = vsel %vm75_vm0, %v1987_v6, 0.0 }
   0x3   :  { %v76_v5 = vsel %vm75_vm0, %v1976_v2, 0.0  ;;  %89 = vadd.xlane.f32.xlu2 %v88_v3  ;;  %83 = vadd.xlane.f32.xlu1 %v82_v4  ;;  %v85_v10 = vsel %vm75_vm0, %v1992_v7, 0.0  ;;  %v79_v11 = vsel %vm75_vm0, %v1997_v8, 0.0  ;;  %v2008_v12 = vld [vmem:[%s4454_s0 + $0x40] sm:$0xff]  ;;  %v2013_v13 = vld [vmem:[%s4454_s0 + $0x38] sm:$0xff]  ;;  %v2018_v14 = vld [vmem:[%s4454_s0 + $0x30] sm:$0xff] }
   0x4   :  { %77 = vadd.xlane.f32.xlu0 %v76_v5  ;;  %v100_v15 = vsel %vm75_vm0, %v2008_v12, 0.0  ;;  %v97_v16 = vsel %vm75_vm0, %v2013_v13, 0.0  ;;  %v94_v17 = vsel %vm75_vm0, %v2018_v14, 0.0  ;;  %v2029_v18 = vld [vmem:[%s4454_s0 + $0x58] sm:$0xff]  ;;  %v2034_v19 = vld [vmem:[%s4454_s0 + $0x50] sm:$0xff]  ;;  %v2039_v20 = vld [vmem:[%s4454_s0 + $0x48] sm:$0xff] }
   0x5   :  { %v109_v21 = vsel %vm75_vm0, %v2029_v18, 0.0  ;;  %v106_v22 = vsel %vm75_vm0, %v2034_v19, 0.0  ;;  %v103_v23 = vsel %vm75_vm0, %v2039_v20, 0.0  ;;  %v2050_v24 = vld [vmem:[%s4454_s0 + $0x70] sm:$0xff]  ;;  %v2055_v25 = vld [vmem:[%s4454_s0 + $0x68] sm:$0xff]  ;;  %v2060_v26 = vld [vmem:[%s4454_s0 + $0x60] sm:$0xff] }
   0x6   :  { %v118_v27 = vsel %vm75_vm0, %v2050_v24, 0.0  ;;  %v115_v28 = vsel %vm75_vm0, %v2055_v25, 0.0  ;;  %v112_v29 = vsel %vm75_vm0, %v2060_v26, 0.0  ;;  %v2071_v30 = vld [vmem:[%s4454_s0 + $0x88] sm:$0xff]  ;;  %v2076_v31 = vld [vmem:[%s4454_s0 + $0x80] sm:$0xff]  ;;  %v2081_v32 = vld [vmem:[%s4454_s0 + $0x78] sm:$0xff] }
   0x7   :  { %v127_v33 = vsel %vm75_vm0, %v2071_v30, 0.0  ;;  %v124_v34 = vsel %vm75_vm0, %v2076_v31, 0.0  ;;  %v121_v35 = vsel %vm75_vm0, %v2081_v32, 0.0  ;;  %v2092_v36 = vld [vmem:[%s4454_s0 + $0xa0] sm:$0xff]  ;;  %v2097_v37 = vld [vmem:[%s4454_s0 + $0x98] sm:$0xff]  ;;  %v2102_v38 = vld [vmem:[%s4454_s0 + $0x90] sm:$0xff] }
   0x8   :  { %v136_v39 = vsel %vm75_vm0, %v2092_v36, 0.0  ;;  %v133_v40 = vsel %vm75_vm0, %v2097_v37, 0.0  ;;  %v130_v41 = vsel %vm75_vm0, %v2102_v38, 0.0  ;;  %v2113_v42 = vld [vmem:[%s4454_s0 + $0xb8] sm:$0xff]  ;;  %v2118_v43 = vld [vmem:[%s4454_s0 + $0xb0] sm:$0xff]  ;;  %v2123_v44 = vld [vmem:[%s4454_s0 + $0xa8] sm:$0xff] }
   0x9   :  { %v145_v45 = vsel %vm75_vm0, %v2113_v42, 0.0  ;;  %v142_v46 = vsel %vm75_vm0, %v2118_v43, 0.0  ;;  %v139_v47 = vsel %vm75_vm0, %v2123_v44, 0.0  ;;  %v2134_v48 = vld [vmem:[%s4454_s0 + $0xd0] sm:$0xff]  ;;  %v2139_v49 = vld [vmem:[%s4454_s0 + $0xc8] sm:$0xff]  ;;  %v2144_v50 = vld [vmem:[%s4454_s0 + $0xc0] sm:$0xff] }
   0xa   :  { %v154_v51 = vsel %vm75_vm0, %v2134_v48, 0.0  ;;  %v151_v52 = vsel %vm75_vm0, %v2139_v49, 0.0  ;;  %v148_v53 = vsel %vm75_vm0, %v2144_v50, 0.0  ;;  %v2155_v54 = vld [vmem:[%s4454_s0 + $0xe8] sm:$0xff]  ;;  %v2160_v55 = vld [vmem:[%s4454_s0 + $0xe0] sm:$0xff]  ;;  %v2165_v56 = vld [vmem:[%s4454_s0 + $0xd8] sm:$0xff] }
   0xb   :  { %92 = vadd.xlane.f32.xlu2 %v91_v9  ;;  %86 = vadd.xlane.f32.xlu1 %v85_v10  ;;  %v163_v57 = vsel %vm75_vm0, %v2155_v54, 0.0  ;;  %v160_v58 = vsel %vm75_vm0, %v2160_v55, 0.0  ;;  %v157_v59 = vsel %vm75_vm0, %v2165_v56, 0.0  ;;  %v2176_v60 = vld [vmem:[%s4454_s0 + $0x100] sm:$0xff]  ;;  %v2181_v61 = vld [vmem:[%s4454_s0 + $0xf8] sm:$0xff]  ;;  %v2186_v62 = vld [vmem:[%s4454_s0 + $0xf0] sm:$0xff] }
   0xc   :  { %80 = vadd.xlane.f32.xlu0 %v79_v11  ;;  %v172_v63 = vsel %vm75_vm0, %v2176_v60, 0.0  ;;  %v169_v3 = vsel %vm75_vm0, %v2181_v61, 0.0  ;;  %v166_v4 = vsel %vm75_vm0, %v2186_v62, 0.0  ;;  %v2197_v5 = vld [vmem:[%s4454_s0 + $0x118] sm:$0xff]  ;;  %v2202_v9 = vld [vmem:[%s4454_s0 + $0x110] sm:$0xff]  ;;  %v2207_v10 = vld [vmem:[%s4454_s0 + $0x108] sm:$0xff] }
   0xd   :  { %v181_v11 = vsel %vm75_vm0, %v2197_v5, 0.0 }
  0x13   :  { %101 = vadd.xlane.f32.xlu2 %v100_v15  ;;  %98 = vadd.xlane.f32.xlu1 %v97_v16  ;;  %v178_v15 = vsel %vm75_vm0, %v2202_v9, 0.0  ;;  %v175_v16 = vsel %vm75_vm0, %v2207_v10, 0.0 }
  0x14   :  { %95 = vadd.xlane.f32.xlu0 %v94_v17  ;;  %v2218_v17 = vld [vmem:[%s4454_s0 + $0x130] sm:$0xff] }
  0x15   :  { %4478 = vst [vmem:[#allocation2_spill] sm:$0xff] %v2218_v17 }
  0x1b   :  { %110 = vadd.xlane.f32.xlu2 %v109_v21  ;;  %107 = vadd.xlane.f32.xlu1 %v106_v22  ;;  %v2223_v21 = vld [vmem:[%s4454_s0 + $0x128] sm:$0xff]  ;;  %v2228_v22 = vld [vmem:[%s4454_s0 + $0x120] sm:$0xff] }
  0x1c   :  { %104 = vadd.xlane.f32.xlu0 %v103_v23  ;;  %v190_v23 = vsel %vm75_vm0, %v2218_v17, 0.0 }
  0x23   :  { %119 = vadd.xlane.f32.xlu2 %v118_v27  ;;  %116 = vadd.xlane.f32.xlu1 %v115_v28  ;;  %v187_v27 = vsel %vm75_vm0, %v2223_v21, 0.0  ;;  %v184_v28 = vsel %vm75_vm0, %v2228_v22, 0.0 }
  0x24   :  { %113 = vadd.xlane.f32.xlu0 %v112_v29  ;;  %v2239_v29 = vld [vmem:[%s4454_s0 + $0x148] sm:$0xff] }
  0x25   :  { %4479 = vst [vmem:[#allocation3_spill] sm:$0xff] %v2239_v29 }
  0x2b   :  { %128 = vadd.xlane.f32.xlu2 %v127_v33  ;;  %125 = vadd.xlane.f32.xlu1 %v124_v34  ;;  %v2244_v33 = vld [vmem:[%s4454_s0 + $0x140] sm:$0xff]  ;;  %v2249_v34 = vld [vmem:[%s4454_s0 + $0x138] sm:$0xff] }
  0x2c   :  { %122 = vadd.xlane.f32.xlu0 %v121_v35  ;;  %4480 = vst [vmem:[#allocation4_spill] sm:$0xff] %v2244_v33  ;;  %v199_v35 = vsel %vm75_vm0, %v2239_v29, 0.0 }
  0x2d   :  { %4481 = vst [vmem:[#allocation5_spill] sm:$0xff] %v2249_v34 }
  0x33   :  { %137 = vadd.xlane.f32.xlu2 %v136_v39  ;;  %134 = vadd.xlane.f32.xlu1 %v133_v40  ;;  %v196_v39 = vsel %vm75_vm0, %v2244_v33, 0.0  ;;  %v193_v40 = vsel %vm75_vm0, %v2249_v34, 0.0  ;;  %v269_v34 = vmul.f32 %v1997_v8, %v1997_v8  ;;  %v268_v33 = vmul.f32 %v1976_v2, %v1976_v2 }
  0x34   :  { %131 = vadd.xlane.f32.xlu0 %v130_v41  ;;  %v2260_v41 = vld [vmem:[%s4454_s0 + $0x160] sm:$0xff]  ;;  %v272_v2 = vmul.f32 %v1966_v0, %v1966_v0  ;;  %v271_v8 = vmul.f32 %v1992_v7, %v1992_v7  ;;  %v275_v0 = vmul.f32 %v2013_v13, %v2013_v13  ;;  %v273_v7 = vmul.f32 %v1987_v6, %v1987_v6 }
  0x35   :  { %4482 = vst [vmem:[#allocation6_spill] sm:$0xff] %v2260_v41  ;;  %v278_v13 = vmul.f32 %v2034_v19, %v2034_v19  ;;  %v277_v6 = vmul.f32 %v2039_v20, %v2039_v20  ;;  %v281_v19 = vmul.f32 %v2055_v25, %v2055_v25  ;;  %v279_v20 = vmul.f32 %v2029_v18, %v2029_v18 }
  0x36   :  { %v284_v25 = vmul.f32 %v2076_v31, %v2076_v31  ;;  %v283_v18 = vmul.f32 %v2081_v32, %v2081_v32  ;;  %v287_v31 = vmul.f32 %v2097_v37, %v2097_v37  ;;  %v285_v32 = vmul.f32 %v2071_v30, %v2071_v30 }
  0x37   :  { %v290_v37 = vmul.f32 %v2118_v43, %v2118_v43  ;;  %v289_v30 = vmul.f32 %v2123_v44, %v2123_v44  ;;  %v293_v43 = vmul.f32 %v2139_v49, %v2139_v49  ;;  %v291_v44 = vmul.f32 %v2113_v42, %v2113_v42 }
  0x38   :  { %v296_v49 = vmul.f32 %v2160_v55, %v2160_v55  ;;  %v295_v42 = vmul.f32 %v2165_v56, %v2165_v56  ;;  %v299_v55 = vmul.f32 %v2181_v61, %v2181_v61  ;;  %v297_v56 = vmul.f32 %v2155_v54, %v2155_v54 }
  0x39   :  { %v302_v61 = vmul.f32 %v2202_v9, %v2202_v9  ;;  %v301_v54 = vmul.f32 %v2207_v10, %v2207_v10 }
  0x3b   :  { %146 = vadd.xlane.f32.xlu2 %v145_v45  ;;  %143 = vadd.xlane.f32.xlu1 %v142_v46  ;;  %v2265_v45 = vld [vmem:[%s4454_s0 + $0x158] sm:$0xff]  ;;  %v2270_v46 = vld [vmem:[%s4454_s0 + $0x150] sm:$0xff] }
  0x3c   :  { %140 = vadd.xlane.f32.xlu0 %v139_v47  ;;  %4483 = vst [vmem:[#allocation7_spill] sm:$0xff] %v2265_v45  ;;  %v208_v47 = vsel %vm75_vm0, %v2260_v41, 0.0 }
  0x3d   :  { %4484 = vst [vmem:[#allocation8_spill] sm:$0xff] %v2270_v46 }
  0x43   :  { %155 = vadd.xlane.f32.xlu2 %v154_v51  ;;  %152 = vadd.xlane.f32.xlu1 %v151_v52  ;;  %v205_v51 = vsel %vm75_vm0, %v2265_v45, 0.0  ;;  %v202_v52 = vsel %vm75_vm0, %v2270_v46, 0.0  ;;  %v73_v46 = vld [vmem:[%s4454_s0 + $0x1f0] sm:$0xff]  ;;  %v72_v45 = vld [vmem:[%s4454_s0 + $0x1e8] sm:$0xff] }
  0x44   :  { %149 = vadd.xlane.f32.xlu0 %v148_v53  ;;  %v2281_v53 = vld [vmem:[%s4454_s0 + $0x178] sm:$0xff] }
  0x45   :  { %4485 = vst [vmem:[#allocation9_spill] sm:$0xff] %v2281_v53 }
  0x4b   :  { %164 = vadd.xlane.f32.xlu2 %v163_v57  ;;  %161 = vadd.xlane.f32.xlu1 %v160_v58  ;;  %v2286_v57 = vld [vmem:[%s4454_s0 + $0x170] sm:$0xff] }
  0x4c   :  { %158 = vadd.xlane.f32.xlu0 %v157_v59  ;;  %4486 = vst [vmem:[#allocation10_spill] sm:$0xff] %v2286_v57 }
  0x53   :  { %173 = vadd.xlane.f32.xlu2 %v172_v63  ;;  %170 = vadd.xlane.f32.xlu1 %v169_v3  ;;  %v2295_v63 = vld [vmem:[%s4454_s0 + $0x168] sm:$0xff] }
  0x54   :  { %167 = vadd.xlane.f32.xlu0 %v166_v4  ;;  %4487 = vst [vmem:[#allocation11_spill] sm:$0xff] %v2295_v63  ;;  %v217_v4 = vsel %vm75_vm0, %v2281_v53, 0.0 }
  0x5b   :  { %182 = vadd.xlane.f32.xlu2 %v181_v11  ;;  %179 = vadd.xlane.f32.xlu1 %v178_v15  ;;  %v214_v11 = vsel %vm75_vm0, %v2286_v57, 0.0  ;;  %v211_v15 = vsel %vm75_vm0, %v2295_v63, 0.0  ;;  %v70_v63 = vld [vmem:[%s4454_s0 + $0x1d8] sm:$0xff]  ;;  %v2392_v57 = vld [vmem:[%s4454_s0 + $0x1d0] sm:$0xff] }
  0x5c   :  { %176 = vadd.xlane.f32.xlu0 %v175_v16  ;;  %v2308_v16 = vld [vmem:[%s4454_s0 + $0x190] sm:$0xff]  ;;  %4497 = vst [vmem:[#allocation21_spill] sm:$0xff] %v2392_v57 }
  0x5d   :  { %4488 = vst [vmem:[#allocation12_spill] sm:$0xff] %v2308_v16 }
  0x63   :  { %191 = vadd.xlane.f32.xlu2 %v190_v23  ;;  %188 = vadd.xlane.f32.xlu1 %v187_v27  ;;  %v2313_v23 = vld [vmem:[%s4454_s0 + $0x188] sm:$0xff] }
  0x64   :  { %185 = vadd.xlane.f32.xlu0 %v184_v28  ;;  %4489 = vst [vmem:[#allocation13_spill] sm:$0xff] %v2313_v23 }
  0x6b   :  { %200 = vadd.xlane.f32.xlu2 %v199_v35  ;;  %197 = vadd.xlane.f32.xlu1 %v196_v39  ;;  %v2322_v35 = vld [vmem:[%s4454_s0 + $0x180] sm:$0xff] }
  0x6c   :  { %194 = vadd.xlane.f32.xlu0 %v193_v40  ;;  %4490 = vst [vmem:[#allocation14_spill] sm:$0xff] %v2322_v35  ;;  %v226_v40 = vsel %vm75_vm0, %v2308_v16, 0.0 }
  0x73   :  { %209 = vadd.xlane.f32.xlu2 %v208_v47  ;;  %206 = vadd.xlane.f32.xlu1 %v205_v51  ;;  %v223_v47 = vsel %vm75_vm0, %v2313_v23, 0.0  ;;  %v220_v51 = vsel %vm75_vm0, %v2322_v35, 0.0  ;;  %v2362_v35 = vld [vmem:[%s4454_s0 + $0x1c0] sm:$0xff]  ;;  %v2367_v23 = vld [vmem:[%s4454_s0 + $0x1b8] sm:$0xff] }
  0x74   :  { %203 = vadd.xlane.f32.xlu0 %v202_v52  ;;  %v2335_v52 = vld [vmem:[%s4454_s0 + $0x1a8] sm:$0xff]  ;;  %4494 = vst [vmem:[#allocation18_spill] sm:$0xff] %v2362_v35 }
  0x75   :  { %4491 = vst [vmem:[#allocation15_spill] sm:$0xff] %v2335_v52 }
  0x76   :  { %v2288_v58 = vpop.xlane.xlu2 %89  ;;  %v2290_v59 = vpop.xlane.xlu1 %83  ;;  %4495 = vst [vmem:[#allocation19_spill] sm:$0xff] %v2367_v23 }
  0x77   :  { %v2297_v3 = vpop.xlane.xlu0 %77  ;;  %v526_v9 = vmul.f32 0.020833334, %v2290_v59 }
  0x78   :  { %v524_v10 = vmul.f32 0.020833334, %v2297_v3  ;;  %v303_v3 = vmul.f32 %v2197_v5, %v2197_v5 }
  0x7b   :  { %218 = vadd.xlane.f32.xlu2 %v217_v4  ;;  %215 = vadd.xlane.f32.xlu1 %v214_v11  ;;  %v2340_v4 = vld [vmem:[%s4454_s0 + $0x1a0] sm:$0xff] }
  0x7c   :  { %212 = vadd.xlane.f32.xlu0 %v211_v15  ;;  %4492 = vst [vmem:[#allocation16_spill] sm:$0xff] %v2340_v4  ;;  %v232_v16 = vsel %vm75_vm0, %v2340_v4, 0.0 }
  0x7e   :  { %v2315_v27 = vpop.xlane.xlu2 %92  ;;  %v2317_v28 = vpop.xlane.xlu1 %86 }
  0x7f   :  { %v2324_v39 = vpop.xlane.xlu0 %80  ;;  %v527_v59 = vmul.f32 0.020833334, %v2317_v28 }
  0x83   :  { %227 = vadd.xlane.f32.xlu2 %v226_v40  ;;  %224 = vadd.xlane.f32.xlu1 %v223_v47  ;;  %v2349_v40 = vld [vmem:[%s4454_s0 + $0x198] sm:$0xff] }
  0x84   :  { %221 = vadd.xlane.f32.xlu0 %v220_v51  ;;  %4493 = vst [vmem:[#allocation17_spill] sm:$0xff] %v2349_v40  ;;  %v235_v51 = vsel %vm75_vm0, %v2335_v52, 0.0  ;;  %v229_v53 = vsel %vm75_vm0, %v2349_v40, 0.0  ;;  %v241_v40 = vsel %vm75_vm0, %v2367_v23, 0.0 }
  0x86   :  { %v2342_v11 = vpop.xlane.xlu2 %101  ;;  %v2344_v15 = vpop.xlane.xlu1 %98 }
  0x87   :  { %v2351_v47 = vpop.xlane.xlu0 %95 }
  0x8b   :  { %236 = vadd.xlane.f32.xlu2 %v235_v51  ;;  %233 = vadd.xlane.f32.xlu1 %v232_v16  ;;  %v2376_v51 = vld [vmem:[%s4454_s0 + $0x1b0] sm:$0xff]  ;;  %v244_v16 = vsel %vm75_vm0, %v2362_v35, 0.0 }
  0x8c   :  { %230 = vadd.xlane.f32.xlu0 %v229_v53  ;;  %4496 = vst [vmem:[#allocation20_spill] sm:$0xff] %v2376_v51  ;;  %v238_v4 = vsel %vm75_vm0, %v2376_v51, 0.0  ;;  %v2401_v51 = vld [vmem:[%s4454_s0 + $0x1c8] sm:$0xff] }
  0x8d   :  { %4498 = vst [vmem:[#allocation22_spill] sm:$0xff] %v2401_v51  ;;  %v247_v23 = vsel %vm75_vm0, %v2401_v51, 0.0 }
  0x8e   :  { %v2369_v52 = vpop.xlane.xlu2 %110  ;;  %v2371_v41 = vpop.xlane.xlu1 %107 }
  0x8f   :  { %v2378_v53 = vpop.xlane.xlu0 %104  ;;  %v535_v28 = vmul.f32 0.020833334, %v2369_v52  ;;  %v534_v5 = vmul.f32 0.020833334, %v2371_v41  ;;  %v437_v52 = vsel %vm75_vm0, %v303_v3, 0.0 }
  0x93   :  { %245 = vadd.xlane.f32.xlu2 %v244_v16  ;;  %242 = vadd.xlane.f32.xlu1 %v241_v40  ;;  %v250_v16 = vsel %vm75_vm0, %v2392_v57, 0.0  ;;  %v71_v57 = vld [vmem:[%s4454_s0 + $0x1e0] sm:$0xff] }
  0x94   :  { %239 = vadd.xlane.f32.xlu0 %v238_v4  ;;  %v253_v4 = vsel %vm75_vm0, %v70_v63, 0.0 }
  0x96   :  { %v2394_v29 = vpop.xlane.xlu2 %119  ;;  %v2396_v35 = vpop.xlane.xlu1 %116 }
  0x97   :  { %v2403_v40 = vpop.xlane.xlu0 %113 }
  0x9b   :  { %254 = vadd.xlane.f32.xlu2 %v253_v4  ;;  %251 = vadd.xlane.f32.xlu1 %v250_v16  ;;  %v259_v4 = vsel %vm75_vm0, %v72_v45, 0.0  ;;  %v256_v16 = vsel %vm75_vm0, %v71_v57, 0.0  ;;  %v335_v57 = vsel %vm75_vm0, %v269_v34, 0.0 }
  0x9c   :  { %248 = vadd.xlane.f32.xlu0 %v247_v23  ;;  %v262_v23 = vsel %vm75_vm0, %v73_v46, 0.0  ;;  %v74_v46 = vld [vmem:[%s4454_s0 + $0x1f8] sm:$0xff] }
  0x9e   :  { %v2416_v17 = vpop.xlane.xlu2 %128  ;;  %v2418_v63 = vpop.xlane.xlu1 %125 }
  0x9f   :  { %4499 = vst [vmem:[#allocation23_spill] sm:$0xff] %v2416_v17  ;;  %v2423_v51 = vpop.xlane.xlu0 %122 }
  0xa0   :  { %4500 = vst [vmem:[#allocation24_spill] sm:$0xff] %v2418_v63 }
  0xa3   :  { %263 = vadd.xlane.f32.xlu2 %v262_v23  ;;  %260 = vadd.xlane.f32.xlu1 %v259_v4  ;;  %v332_v23 = vsel %vm75_vm0, %v268_v33, 0.0  ;;  %v265_v4 = vsel %vm75_vm0, %v74_v46, 0.0  ;;  %v344_v33 = vsel %vm75_vm0, %v272_v2, 0.0  ;;  %v341_v46 = vsel %vm75_vm0, %v271_v8, 0.0 }
  0xa4   :  { %257 = vadd.xlane.f32.xlu0 %v256_v16  ;;  %v270_v16 = vmul.f32 %v1971_v1, %v1971_v1  ;;  %v274_v1 = vmul.f32 %v2018_v14, %v2018_v14  ;;  %v353_v8 = vsel %vm75_vm0, %v275_v0, 0.0  ;;  %v276_v14 = vmul.f32 %v2008_v12, %v2008_v12 }
  0xa5   :  { %v280_v12 = vmul.f32 %v2060_v26, %v2060_v26  ;;  %v282_v26 = vmul.f32 %v2050_v24, %v2050_v24  ;;  %v286_v24 = vmul.f32 %v2102_v38, %v2102_v38  ;;  %v288_v38 = vmul.f32 %v2092_v36, %v2092_v36 }
  0xa6   :  { %v2432_v63 = vpop.xlane.xlu2 %137  ;;  %v2434_v17 = vpop.xlane.xlu1 %134  ;;  %v292_v36 = vmul.f32 %v2144_v50, %v2144_v50  ;;  %v294_v50 = vmul.f32 %v2134_v48, %v2134_v48  ;;  %v298_v48 = vmul.f32 %v2186_v62, %v2186_v62  ;;  %v300_v62 = vmul.f32 %v2176_v60, %v2176_v60 }
  0xa7   :  { %4501 = vst [vmem:[#allocation25_spill] sm:$0xff] %v2434_v17  ;;  %v2439_v45 = vpop.xlane.xlu0 %131  ;;  %v529_v60 = vmul.f32 0.020833334, %v2315_v27  ;;  %v525_v27 = vmul.f32 0.020833334, %v2324_v39 }
  0xa8   :  { %4502 = vst [vmem:[#allocation26_spill] sm:$0xff] %v2439_v45  ;;  %v533_v39 = vmul.f32 0.020833334, %v2378_v53  ;;  %v4507_v53 = vld [vmem:[#allocation23_spill] sm:$0xff] }
  0xab   :  { %336 = vadd.xlane.f32.xlu2 %v335_v57  ;;  %333 = vadd.xlane.f32.xlu1 %v332_v23  ;;  %v338_v57 = vsel %vm75_vm0, %v270_v16, 0.0  ;;  %v350_v16 = vsel %vm75_vm0, %v274_v1, 0.0  ;;  %v362_v1 = vsel %vm75_vm0, %v278_v13, 0.0 }
  0xac   :  { %266 = vadd.xlane.f32.xlu0 %v265_v4 }
  0xae   :  { %v2450_v17 = vpop.xlane.xlu2 %146  ;;  %v2452_v45 = vpop.xlane.xlu1 %143 }
  0xaf   :  { %v2454_v34 = vpop.xlane.xlu0 %140 }
  0xb3   :  { %345 = vadd.xlane.f32.xlu2 %v344_v33  ;;  %342 = vadd.xlane.f32.xlu1 %v341_v46  ;;  %v347_v33 = vsel %vm75_vm0, %v273_v7, 0.0  ;;  %v359_v7 = vsel %vm75_vm0, %v277_v6, 0.0  ;;  %v371_v6 = vsel %vm75_vm0, %v281_v19, 0.0 }
  0xb4   :  { %339 = vadd.xlane.f32.xlu0 %v338_v57 }
  0xb6   :  { %v2465_v23 = vpop.xlane.xlu2 %155  ;;  %v2467_v4 = vpop.xlane.xlu1 %152 }
  0xb7   :  { %v2469_v2 = vpop.xlane.xlu0 %149 }
  0xbb   :  { %354 = vadd.xlane.f32.xlu2 %v353_v8  ;;  %351 = vadd.xlane.f32.xlu1 %v350_v16  ;;  %v356_v8 = vsel %vm75_vm0, %v276_v14, 0.0  ;;  %v368_v14 = vsel %vm75_vm0, %v280_v12, 0.0  ;;  %v380_v12 = vsel %vm75_vm0, %v284_v25, 0.0 }
  0xbc   :  { %348 = vadd.xlane.f32.xlu0 %v347_v33 }
  0xbe   :  { %v2480_v46 = vpop.xlane.xlu2 %164  ;;  %v2482_v57 = vpop.xlane.xlu1 %161 }
  0xbf   :  { %v2484_v0 = vpop.xlane.xlu0 %158 }
  0xc3   :  { %363 = vadd.xlane.f32.xlu2 %v362_v1  ;;  %360 = vadd.xlane.f32.xlu1 %v359_v7  ;;  %v365_v1 = vsel %vm75_vm0, %v279_v20, 0.0  ;;  %v377_v20 = vsel %vm75_vm0, %v283_v18, 0.0  ;;  %v389_v18 = vsel %vm75_vm0, %v287_v31, 0.0 }
  0xc4   :  { %357 = vadd.xlane.f32.xlu0 %v356_v8 }
  0xc6   :  { %v2495_v16 = vpop.xlane.xlu2 %173  ;;  %v2497_v33 = vpop.xlane.xlu1 %170 }
  0xc7   :  { %v2499_v13 = vpop.xlane.xlu0 %167 }
  0xcb   :  { %372 = vadd.xlane.f32.xlu2 %v371_v6  ;;  %369 = vadd.xlane.f32.xlu1 %v368_v14  ;;  %v374_v6 = vsel %vm75_vm0, %v282_v26, 0.0  ;;  %v386_v26 = vsel %vm75_vm0, %v286_v24, 0.0  ;;  %v398_v24 = vsel %vm75_vm0, %v290_v37, 0.0 }
  0xcc   :  { %366 = vadd.xlane.f32.xlu0 %v365_v1 }
  0xce   :  { %v2510_v7 = vpop.xlane.xlu2 %182  ;;  %v2512_v8 = vpop.xlane.xlu1 %179 }
  0xcf   :  { %v2514_v19 = vpop.xlane.xlu0 %176 }
  0xd3   :  { %381 = vadd.xlane.f32.xlu2 %v380_v12  ;;  %378 = vadd.xlane.f32.xlu1 %v377_v20  ;;  %v383_v12 = vsel %vm75_vm0, %v285_v32, 0.0  ;;  %v395_v32 = vsel %vm75_vm0, %v289_v30, 0.0  ;;  %v407_v30 = vsel %vm75_vm0, %v293_v43, 0.0 }
  0xd4   :  { %375 = vadd.xlane.f32.xlu0 %v374_v6 }
  0xd6   :  { %v2525_v14 = vpop.xlane.xlu2 %191  ;;  %v2527_v1 = vpop.xlane.xlu1 %188 }
  0xd7   :  { %v2529_v25 = vpop.xlane.xlu0 %185 }
  0xdb   :  { %390 = vadd.xlane.f32.xlu2 %v389_v18  ;;  %387 = vadd.xlane.f32.xlu1 %v386_v26  ;;  %v392_v18 = vsel %vm75_vm0, %v288_v38, 0.0  ;;  %v404_v38 = vsel %vm75_vm0, %v292_v36, 0.0  ;;  %v416_v36 = vsel %vm75_vm0, %v296_v49, 0.0 }
  0xdc   :  { %384 = vadd.xlane.f32.xlu0 %v383_v12 }
  0xde   :  { %v2540_v20 = vpop.xlane.xlu2 %200  ;;  %v2542_v6 = vpop.xlane.xlu1 %197 }
  0xdf   :  { %v2544_v31 = vpop.xlane.xlu0 %194 }
  0xe3   :  { %399 = vadd.xlane.f32.xlu2 %v398_v24  ;;  %396 = vadd.xlane.f32.xlu1 %v395_v32  ;;  %v401_v24 = vsel %vm75_vm0, %v291_v44, 0.0  ;;  %v413_v44 = vsel %vm75_vm0, %v295_v42, 0.0  ;;  %v425_v42 = vsel %vm75_vm0, %v299_v55, 0.0 }
  0xe4   :  { %393 = vadd.xlane.f32.xlu0 %v392_v18 }
  0xe6   :  { %v2555_v26 = vpop.xlane.xlu2 %209  ;;  %v2557_v12 = vpop.xlane.xlu1 %206 }
  0xe7   :  { %v2559_v37 = vpop.xlane.xlu0 %203 }
  0xeb   :  { %408 = vadd.xlane.f32.xlu2 %v407_v30  ;;  %405 = vadd.xlane.f32.xlu1 %v404_v38  ;;  %v410_v30 = vsel %vm75_vm0, %v294_v50, 0.0  ;;  %v422_v50 = vsel %vm75_vm0, %v298_v48, 0.0  ;;  %v434_v48 = vsel %vm75_vm0, %v302_v61, 0.0  ;;  %v304_v61 = vmul.f32 %v2228_v22, %v2228_v22 }
  0xec   :  { %402 = vadd.xlane.f32.xlu0 %v401_v24 }
  0xee   :  { %v2570_v32 = vpop.xlane.xlu2 %218  ;;  %v2572_v18 = vpop.xlane.xlu1 %215 }
  0xef   :  { %v2574_v43 = vpop.xlane.xlu0 %212 }
  0xf3   :  { %417 = vadd.xlane.f32.xlu2 %v416_v36  ;;  %414 = vadd.xlane.f32.xlu1 %v413_v44  ;;  %v419_v36 = vsel %vm75_vm0, %v297_v56, 0.0  ;;  %v431_v56 = vsel %vm75_vm0, %v301_v54, 0.0 }
  0xf4   :  { %411 = vadd.xlane.f32.xlu0 %v410_v30 }
  0xf6   :  { %v2585_v38 = vpop.xlane.xlu2 %227  ;;  %v2587_v24 = vpop.xlane.xlu1 %224 }
  0xf7   :  { %v2589_v49 = vpop.xlane.xlu0 %221 }
  0xfb   :  { %426 = vadd.xlane.f32.xlu2 %v425_v42  ;;  %423 = vadd.xlane.f32.xlu1 %v422_v50  ;;  %v528_v42 = vmul.f32 0.020833334, %v2288_v58  ;;  %v428_v50 = vsel %vm75_vm0, %v300_v62, 0.0  ;;  %v2619_v58 = vmul.f32 %v526_v9, %v526_v9  ;;  %v2624_v62 = vmul.f32 %v524_v10, %v524_v10 }
  0xfc   :  { %420 = vadd.xlane.f32.xlu0 %v419_v36  ;;  %v305_v36 = vmul.f32 %v2223_v21, %v2223_v21  ;;  %v531_v21 = vmul.f32 0.020833334, %v2344_v15  ;;  %v530_v9 = vmul.f32 0.020833334, %v2351_v47  ;;  %v440_v10 = vsel %vm75_vm0, %v304_v61, 0.0 }
  0xfd   :  { %v2617_v54 = vmul.f32 %v528_v42, %v528_v42  ;;  %4504 = vst [vmem:[#allocation28_spill] sm:$0xff] %v2619_v58  ;;  %v2633_v42 = vmul.f32 %v529_v60, %v529_v60  ;;  %v2644_v58 = vmul.f32 %v527_v59, %v527_v59  ;;  %v537_v60 = vmul.f32 0.020833334, %v2396_v35  ;;  %v4509_v59 = vld [vmem:[#allocation24_spill] sm:$0xff] }
  0xfe   :  { %v2600_v44 = vpop.xlane.xlu2 %236  ;;  %v2602_v30 = vpop.xlane.xlu1 %233  ;;  %v443_v15 = vsel %vm75_vm0, %v305_v36, 0.0  ;;  %v536_v47 = vmul.f32 0.020833334, %v2403_v40  ;;  %v2658_v36 = vmul.f32 %v535_v28, %v535_v28  ;;  %v2660_v61 = vmul.f32 %v534_v5, %v534_v5 }
  0xff   :  { %v2604_v55 = vpop.xlane.xlu0 %230  ;;  %4503 = vst [vmem:[#allocation27_spill] sm:$0xff] %v2617_v54  ;;  %v2656_v54 = vmul.f32 %v530_v9, %v530_v9  ;;  %v540_v35 = vmul.f32 0.020833334, %v4509_v59  ;;  %v2663_v40 = vmul.f32 %v533_v39, %v533_v39  ;;  %v539_v5 = vmul.f32 0.020833334, %v2423_v51  ;;  %v4513_v59 = vld [vmem:[#allocation2_spill] sm:$0xff] }
 0x100   :  { %4505 = vst [vmem:[#allocation29_spill] sm:$0xff] %v2633_v42  ;;  %v2649_v42 = vmul.f32 %v525_v27, %v525_v27  ;;  %v4511_v27 = vld [vmem:[#allocation4_spill] sm:$0xff]  ;;  %v2673_v28 = vmul.f32 %v536_v47, %v536_v47  ;;  %v547_v47 = vmul.f32 0.020833334, %v2450_v17  ;;  %v546_v51 = vmul.f32 0.020833334, %v2452_v45 }
 0x101   :  { %4508 = vst [vmem:[#allocation23_spill] sm:$0xff] %v2658_v36  ;;  %v553_v17 = vmul.f32 0.020833334, %v2480_v46 }
 0x103   :  { %435 = vadd.xlane.f32.xlu2 %v434_v48  ;;  %432 = vadd.xlane.f32.xlu1 %v431_v56  ;;  %v532_v48 = vmul.f32 0.020833334, %v2342_v11  ;;  %v538_v11 = vmul.f32 0.020833334, %v2394_v29  ;;  %v541_v29 = vmul.f32 0.020833334, %v4507_v53  ;;  %v2671_v53 = vmul.f32 %v537_v60, %v537_v60 }
 0x104   :  { %429 = vadd.xlane.f32.xlu0 %v428_v50  ;;  %v2687_v60 = vmul.f32 %v540_v35, %v540_v35  ;;  %v548_v35 = vmul.f32 0.020833334, %v2469_v2  ;;  %v551_v2 = vmul.f32 0.020833334, %v2484_v0  ;;  %v4523_v0 = vld [vmem:[#allocation3_spill] sm:$0xff] }
 0x105   :  { %v2651_v41 = vmul.f32 %v532_v48, %v532_v48  ;;  %v2665_v3 = vmul.f32 %v538_v11, %v538_v11  ;;  %v308_v48 = vmul.f32 %v4511_v27, %v4511_v27  ;;  %v2678_v39 = vmul.f32 %v541_v29, %v541_v29 }
 0x106   :  { %v2629_v56 = vpop.xlane.xlu2 %245  ;;  %v2631_v22 = vpop.xlane.xlu1 %242  ;;  %v544_v11 = vmul.f32 0.020833334, %v2432_v63  ;;  %v550_v63 = vmul.f32 0.020833334, %v2465_v23  ;;  %v552_v23 = vmul.f32 0.020833334, %v2482_v57 }
 0x107   :  { %v2638_v50 = vpop.xlane.xlu0 %239  ;;  %4510 = vst [vmem:[#allocation24_spill] sm:$0xff] %v2665_v3  ;;  %v4516_v3 = vld [vmem:[#allocation26_spill] sm:$0xff] }
 0x108   :  { %4506 = vst [vmem:[#allocation30_spill] sm:$0xff] %v2638_v50  ;;  %v2653_v50 = vmul.f32 %v531_v21, %v531_v21  ;;  %v4512_v21 = vld [vmem:[#allocation5_spill] sm:$0xff]  ;;  %v542_v27 = vmul.f32 0.020833334, %v4516_v3  ;;  %v452_v3 = vsel %vm75_vm0, %v308_v48, 0.0  ;;  %v2712_v48 = vmul.f32 %v546_v51, %v546_v51 }
 0x109   :  { %v307_v9 = vmul.f32 %v4512_v21, %v4512_v21  ;;  %4514 = vst [vmem:[#allocation4_spill] sm:$0xff] %v2678_v39  ;;  %v2698_v39 = vmul.f32 %v539_v5, %v539_v5  ;;  %v2717_v46 = vmul.f32 %v550_v63, %v550_v63  ;;  %v556_v51 = vmul.f32 0.020833334, %v2495_v16 }
 0x10a   :  { %v555_v63 = vmul.f32 0.020833334, %v2497_v33  ;;  %v557_v16 = vmul.f32 0.020833334, %v2514_v19  ;;  %v561_v33 = vmul.f32 0.020833334, %v2527_v1 }
 0x10b   :  { %444 = vadd.xlane.f32.xlu2 %v443_v15  ;;  %441 = vadd.xlane.f32.xlu1 %v440_v10  ;;  %v306_v15 = vmul.f32 %v4513_v59, %v4513_v59  ;;  %v4515_v10 = vld [vmem:[#allocation25_spill] sm:$0xff]  ;;  %v545_v59 = vmul.f32 0.020833334, %v2454_v34  ;;  %v563_v1 = vmul.f32 0.020833334, %v2544_v31 }
 0x10c   :  { %438 = vadd.xlane.f32.xlu0 %v437_v52  ;;  %v543_v52 = vmul.f32 0.020833334, %v4515_v10  ;;  %v549_v10 = vmul.f32 0.020833334, %v2467_v4  ;;  %v2710_v4 = vmul.f32 %v547_v47, %v547_v47  ;;  %v2727_v47 = vmul.f32 %v553_v17, %v553_v17 }
 0x10d   :  { %v446_v45 = vsel %vm75_vm0, %v306_v15, 0.0  ;;  %v4520_v15 = vld [vmem:[#allocation7_spill] sm:$0xff]  ;;  %v558_v17 = vmul.f32 0.020833334, %v2512_v8  ;;  %v564_v8 = vmul.f32 0.020833334, %v2542_v6 }
 0x10e   :  { %v2683_v36 = vpop.xlane.xlu2 %254  ;;  %v2685_v21 = vpop.xlane.xlu1 %251  ;;  %v2705_v34 = vmul.f32 %v543_v52, %v543_v52  ;;  %v2719_v5 = vmul.f32 %v549_v10, %v549_v10  ;;  %v4521_v52 = vld [vmem:[#allocation8_spill] sm:$0xff]  ;;  %4522 = vst [vmem:[#allocation26_spill] sm:$0xff] %v2727_v47  ;;  %v554_v10 = vmul.f32 0.020833334, %v2499_v13  ;;  %v560_v13 = vmul.f32 0.020833334, %v2529_v25 }
 0x10f   :  { %4517 = vst [vmem:[#allocation5_spill] sm:$0xff] %v2683_v36  ;;  %v2692_v29 = vpop.xlane.xlu0 %248  ;;  %v449_v36 = vsel %vm75_vm0, %v307_v9, 0.0  ;;  %v2714_v9 = vmul.f32 %v545_v59, %v545_v59  ;;  %v310_v57 = vmul.f32 %v4521_v52, %v4521_v52  ;;  %v2732_v59 = vmul.f32 %v552_v23, %v552_v23 }
 0x110   :  { %4518 = vst [vmem:[#allocation2_spill] sm:$0xff] %v2685_v21  ;;  %v2703_v21 = vmul.f32 %v544_v11, %v544_v11  ;;  %v311_v11 = vmul.f32 %v4520_v15, %v4520_v15  ;;  %v562_v52 = vmul.f32 0.020833334, %v2525_v14  ;;  %v2752_v47 = vmul.f32 %v556_v51, %v556_v51 }
 0x111   :  { %4519 = vst [vmem:[#allocation25_spill] sm:$0xff] %v2692_v29  ;;  %v2707_v29 = vmul.f32 %v542_v27, %v542_v27  ;;  %v2725_v27 = vmul.f32 %v548_v35, %v548_v35  ;;  %v2741_v35 = vmul.f32 %v551_v2, %v551_v2  ;;  %v565_v2 = vmul.f32 0.020833334, %v2540_v20 }
 0x112   :  { %v2759_v14 = vmul.f32 %v554_v10, %v554_v10  ;;  %v568_v25 = vmul.f32 0.020833334, %v2555_v26  ;;  %v567_v20 = vmul.f32 0.020833334, %v2557_v12  ;;  %v2770_v6 = vmul.f32 %v562_v52, %v562_v52  ;;  %v4529_v12 = vld [vmem:[#allocation6_spill] sm:$0xff] }
 0x113   :  { %453 = vadd.xlane.f32.xlu2 %v452_v3  ;;  %450 = vadd.xlane.f32.xlu1 %v449_v36  ;;  %v309_v36 = vmul.f32 %v4523_v0, %v4523_v0  ;;  %v559_v3 = vmul.f32 0.020833334, %v2510_v7  ;;  %v461_v7 = vsel %vm75_vm0, %v311_v11, 0.0  ;;  %v458_v0 = vsel %vm75_vm0, %v310_v57, 0.0 }
 0x114   :  { %447 = vadd.xlane.f32.xlu0 %v446_v45  ;;  %v2765_v11 = vmul.f32 %v558_v17, %v558_v17  ;;  %v2767_v57 = vmul.f32 %v557_v16, %v557_v16  ;;  %v2772_v51 = vmul.f32 %v561_v33, %v561_v33  ;;  %v2778_v10 = vmul.f32 %v560_v13, %v560_v13 }
 0x115   :  { %v455_v19 = vsel %vm75_vm0, %v309_v36, 0.0  ;;  %v4526_v36 = vld [vmem:[#allocation10_spill] sm:$0xff]  ;;  %v2782_v17 = vmul.f32 %v564_v8, %v564_v8  ;;  %v312_v16 = vmul.f32 %v4529_v12, %v4529_v12  ;;  %v2786_v52 = vmul.f32 %v563_v1, %v563_v1 }
 0x116   :  { %v2737_v45 = vpop.xlane.xlu2 %263  ;;  %v2739_v15 = vpop.xlane.xlu1 %260  ;;  %v314_v31 = vmul.f32 %v4526_v36, %v4526_v36  ;;  %v2788_v33 = vmul.f32 %v568_v25, %v568_v25  ;;  %v570_v13 = vmul.f32 0.020833334, %v2572_v18  ;;  %v569_v12 = vmul.f32 0.020833334, %v2574_v43 }
 0x117   :  { %4524 = vst [vmem:[#allocation7_spill] sm:$0xff] %v2739_v15  ;;  %v2746_v23 = vpop.xlane.xlu0 %257  ;;  %v2757_v15 = vmul.f32 %v555_v63, %v555_v63  ;;  %v4527_v63 = vld [vmem:[#allocation11_spill] sm:$0xff]  ;;  %v574_v1 = vmul.f32 0.020833334, %v2585_v38  ;;  %v464_v18 = vsel %vm75_vm0, %v312_v16, 0.0 }
 0x118   :  { %4525 = vst [vmem:[#allocation8_spill] sm:$0xff] %v2746_v23  ;;  %v2763_v23 = vmul.f32 %v559_v3, %v559_v3  ;;  %v313_v26 = vmul.f32 %v4527_v63, %v4527_v63  ;;  %v2780_v3 = vmul.f32 %v565_v2, %v565_v2  ;;  %v2792_v63 = vmul.f32 %v567_v20, %v567_v20 }
 0x119   :  { %4530 = vst [vmem:[#allocation10_spill] sm:$0xff] %v2788_v33  ;;  %v470_v25 = vsel %vm75_vm0, %v314_v31, 0.0  ;;  %v577_v43 = vmul.f32 0.020833334, %v2600_v44  ;;  %v576_v38 = vmul.f32 0.020833334, %v2602_v30  ;;  %v2816_v16 = vmul.f32 %v569_v12, %v569_v12 }
 0x11a   :  { %4528 = vst [vmem:[#allocation3_spill] sm:$0xff] %v2780_v3 }
 0x11b   :  { %462 = vadd.xlane.f32.xlu2 %v461_v7  ;;  %459 = vadd.xlane.f32.xlu1 %v458_v0  ;;  %v566_v7 = vmul.f32 0.020833334, %v2559_v37  ;;  %v571_v0 = vmul.f32 0.020833334, %v2570_v32  ;;  %4531 = vst [vmem:[#allocation11_spill] sm:$0xff] %v2792_v63  ;;  %v467_v37 = vsel %vm75_vm0, %v313_v26, 0.0  ;;  %v2834_v12 = vmul.f32 %v576_v38, %v576_v38 }
 0x11c   :  { %456 = vadd.xlane.f32.xlu0 %v455_v19  ;;  %v573_v32 = vmul.f32 0.020833334, %v2587_v24  ;;  %v4535_v24 = vld [vmem:[#allocation13_spill] sm:$0xff]  ;;  %4537 = vst [vmem:[#allocation33_spill] sm:$0xff] %v2816_v16  ;;  %v579_v38 = vmul.f32 0.020833334, %v2631_v22 }
 0x11d   :  { %4544 = vst [vmem:[#allocation36_spill] sm:$0xff] %v2834_v12 }
 0x11e   :  { %v337_v19 = vpop.xlane.xlu2 %336  ;;  %v334_v36 = vpop.xlane.xlu1 %333  ;;  %v2822_v30 = vmul.f32 %v573_v32, %v573_v32  ;;  %v580_v32 = vmul.f32 0.020833334, %v2629_v56 }
 0x11f   :  { %v589_v2 = vmul.f32 0.020833334, %v337_v19  ;;  %v588_v8 = vmul.f32 0.020833334, %v334_v36  ;;  %v2795_v3 = vpop.xlane.xlu0 %266  ;;  %v2805_v19 = vmul.f32 %v566_v7, %v566_v7  ;;  %v572_v36 = vmul.f32 0.020833334, %v2589_v49 }
 0x120   :  { %4532 = vst [vmem:[#allocation6_spill] sm:$0xff] %v2795_v3  ;;  %v2810_v3 = vmul.f32 %v571_v0, %v571_v0  ;;  %v2818_v7 = vmul.f32 %v574_v1, %v574_v1  ;;  %v4539_v49 = vld [vmem:[#allocation14_spill] sm:$0xff]  ;;  %v575_v1 = vmul.f32 0.020833334, %v2604_v55 }
 0x121   :  { %v717_v33 = vsub.f32 %v589_v2, %v2649_v42  ;;  %v716_v20 = vsub.f32 %v588_v8, %v2624_v62  ;;  %4533 = vst [vmem:[#allocation31_spill] sm:$0xff] %v2805_v19  ;;  %v317_v42 = vmul.f32 %v4535_v24, %v4535_v24  ;;  %v2814_v62 = vmul.f32 %v570_v13, %v570_v13  ;;  %v4541_v2 = vld [vmem:[#allocation9_spill] sm:$0xff] }
 0x122   :  { %4534 = vst [vmem:[#allocation32_spill] sm:$0xff] %v2810_v3  ;;  %v316_v44 = vmul.f32 %v4539_v49, %v4539_v49  ;;  %v315_v8 = vmul.f32 %v4541_v2, %v4541_v2  ;;  %v2832_v13 = vmul.f32 %v577_v43, %v577_v43  ;;  %v4545_v49 = vld [vmem:[#allocation27_spill] sm:$0xff]  ;;  %v4549_v3 = vld [vmem:[#allocation17_spill] sm:$0xff] }
 0x123   :  { %v781_v31 = vmax.f32 %v717_v33, 0.0  ;;  %v780_v26 = vmax.f32 %v716_v20, 0.0  ;;  %471 = vadd.xlane.f32.xlu2 %v470_v25  ;;  %468 = vadd.xlane.f32.xlu1 %v467_v37  ;;  %4536 = vst [vmem:[#allocation13_spill] sm:$0xff] %v2814_v62  ;;  %v2830_v25 = vmul.f32 %v572_v36, %v572_v36 }
 0x124   :  { %4538 = vst [vmem:[#allocation34_spill] sm:$0xff] %v2818_v7  ;;  %465 = vadd.xlane.f32.xlu0 %v464_v18  ;;  %v476_v43 = vsel %vm75_vm0, %v316_v44, 0.0  ;;  %v473_v2 = vsel %vm75_vm0, %v315_v8, 0.0  ;;  %v2847_v7 = vmul.f32 %v575_v1, %v575_v1 }
 0x125   :  { %4540 = vst [vmem:[#allocation14_spill] sm:$0xff] %v2822_v30  ;;  %v2824_v0 = vadd.f32 1e-05, %v781_v31  ;;  %v2826_v33 = vadd.f32 1e-05, %v780_v26  ;;  %v479_v26 = vsel %vm75_vm0, %v317_v42, 0.0 }
 0x126   :  { %4542 = vst [vmem:[#allocation9_spill] sm:$0xff] %v2830_v25  ;;  %v346_v37 = vpop.xlane.xlu2 %345  ;;  %v343_v20 = vpop.xlane.xlu1 %342  ;;  %v4548_v42 = vld [vmem:[#allocation28_spill] sm:$0xff]  ;;  %v4557_v30 = vld [vmem:[#allocation21_spill] sm:$0xff] }
 0x127   :  { %4543 = vst [vmem:[#allocation35_spill] sm:$0xff] %v2832_v13  ;;  %1749 = vrsqrt.f32 %v2824_v0  ;;  %v592_v18 = vmul.f32 0.020833334, %v346_v37  ;;  %v340_v31 = vpop.xlane.xlu0 %339  ;;  %v591_v36 = vmul.f32 0.020833334, %v343_v20  ;;  %v4546_v13 = vld [vmem:[#allocation16_spill] sm:$0xff]  ;;  %v319_v20 = vmul.f32 %v4549_v3, %v4549_v3 }
 0x128   :  { %1751 = vrsqrt.f32 %v2826_v33  ;;  %v590_v24 = vmul.f32 0.020833334, %v340_v31  ;;  %v320_v56 = vmul.f32 %v4546_v13, %v4546_v13  ;;  %4547 = vst [vmem:[#allocation27_spill] sm:$0xff] %v2847_v7  ;;  %v4550_v31 = vld [vmem:[#allocation30_spill] sm:$0xff]  ;;  %vm924_vm1 = vweird.f32 %v2824_v0 }
 0x129   :  { %v720_v55 = vsub.f32 %v592_v18, %v4545_v49  ;;  %v719_v37 = vsub.f32 %v591_v36, %v2644_v58  ;;  %v2854_v44 = vmul.f32 0.020833334, %v4550_v31  ;;  %v4551_v18 = vld [vmem:[#allocation12_spill] sm:$0xff]  ;;  %v4552_v49 = vld [vmem:[#allocation19_spill] sm:$0xff]  ;;  %vm914_vm2 = vweird.f32 %v2826_v33 }
 0x12a   :  { %v718_v12 = vsub.f32 %v590_v24, %v4548_v42  ;;  %v318_v8 = vmul.f32 %v4551_v18, %v4551_v18  ;;  %v323_v13 = vmul.f32 %v4552_v49, %v4552_v49  ;;  %v4553_v58 = vld [vmem:[#allocation20_spill] sm:$0xff]  ;;  %v4554_v24 = vld [vmem:[#allocation15_spill] sm:$0xff]  ;;  %v488_v31 = vsel %vm75_vm0, %v320_v56, 0.0 }
 0x12b   :  { %v784_v22 = vmax.f32 %v720_v55, 0.0  ;;  %480 = vadd.xlane.f32.xlu2 %v479_v26  ;;  %477 = vadd.xlane.f32.xlu1 %v476_v43  ;;  %v783_v1 = vmax.f32 %v719_v37, 0.0  ;;  %v322_v36 = vmul.f32 %v4553_v58, %v4553_v58  ;;  %v321_v3 = vmul.f32 %v4554_v24, %v4554_v24 }
 0x12c   :  { %v782_v7 = vmax.f32 %v718_v12, 0.0  ;;  %474 = vadd.xlane.f32.xlu0 %v473_v2  ;;  %v2866_v55 = vmul.f32 %v580_v32, %v580_v32  ;;  %v2868_v26 = vmul.f32 %v579_v38, %v579_v38  ;;  %v485_v32 = vsel %vm75_vm0, %v319_v20, 0.0 }
 0x12d   :  { %v2864_v42 = vpop.eup %1749  ;;  %v2870_v43 = vadd.f32 1e-05, %v784_v22  ;;  %v2877_v2 = vadd.f32 1e-05, %v783_v1  ;;  %v482_v56 = vsel %vm75_vm0, %v318_v8, 0.0  ;;  %v2887_v24 = vsel %vm75_vm0, %v323_v13, 0.0 }
 0x12e   :  { %4555 = vst [vmem:[#allocation16_spill] sm:$0xff] %v2866_v55  ;;  %v2873_v18 = vpop.eup %1751  ;;  %v919_v12 = vmul.f32 %v2864_v42, %v2824_v0  ;;  %v2879_v37 = vadd.f32 1e-05, %v782_v7  ;;  %v355_v49 = vpop.xlane.xlu2 %354  ;;  %v2892_v7 = vsel %vm75_vm0, %v322_v36, 0.0  ;;  %v2895_v20 = vsel %vm75_vm0, %v321_v3, 0.0 }
 0x12f   :  { %4556 = vst [vmem:[#allocation28_spill] sm:$0xff] %v2868_v26  ;;  %v352_v58 = vpop.xlane.xlu1 %351  ;;  %v909_v38 = vmul.f32 %v2873_v18, %v2826_v33  ;;  %1753 = vrsqrt.f32 %v2870_v43  ;;  %v349_v22 = vpop.xlane.xlu0 %348  ;;  %v595_v26 = vmul.f32 0.020833334, %v355_v49  ;;  %vm925_vm3 = vweird.f32 %v2864_v42  ;;  %v4558_v49 = vld [vmem:[#allocation29_spill] sm:$0xff] }
 0x130   :  { %v920_v1 = vmul.f32 %v2864_v42, %v919_v12  ;;  %1755 = vrsqrt.f32 %v2877_v2  ;;  %v594_v25 = vmul.f32 0.020833334, %v352_v58  ;;  %v593_v13 = vmul.f32 0.020833334, %v349_v22  ;;  %vm926_vm6 = vmor %vm924_vm1, %vm925_vm3 }
 0x131   :  { %v910_v55 = vmul.f32 %v2873_v18, %v909_v38  ;;  %1757 = vrsqrt.f32 %v2879_v37  ;;  %v326_v12 = vmul.f32 %v4557_v30, %v4557_v30  ;;  %v723_v36 = vsub.f32 %v595_v26, %v2653_v50  ;;  %v4560_v50 = vld [vmem:[#allocation18_spill] sm:$0xff] }
 0x132   :  { %v921_v8 = vmul.f32 0.5, %v920_v1  ;;  %v722_v3 = vsub.f32 %v594_v25, %v2656_v54  ;;  %v721_v58 = vsub.f32 %v593_v13, %v4558_v49  ;;  %v4559_v1 = vld [vmem:[#allocation22_spill] sm:$0xff]  ;;  %vm915_vm4 = vweird.f32 %v2873_v18 }
 0x133   :  { %v911_v16 = vmul.f32 0.5, %v910_v55  ;;  %489 = vadd.xlane.f32.xlu2 %v488_v31  ;;  %486 = vadd.xlane.f32.xlu1 %v485_v32  ;;  %v325_v22 = vmul.f32 %v4559_v1, %v4559_v1  ;;  %v787_v55 = vmax.f32 %v723_v36, 0.0  ;;  %v324_v54 = vmul.f32 %v4560_v50, %v4560_v50  ;;  %v2928_v13 = vld [vmem:[%s4455_s1] ss:$0 sm:$0xff]  ;;  %vm916_vm8 = vmor %vm914_vm2, %vm915_vm4 }
 0x134   :  { %v922_v38 = vsub.f32 1.5, %v921_v8  ;;  %483 = vadd.xlane.f32.xlu0 %v482_v56  ;;  %vm954_vm5 = vweird.f32 %v2870_v43  ;;  %v786_v32 = vmax.f32 %v722_v3, 0.0  ;;  %v2921_v8 = vsel %vm75_vm0, %v326_v12, 0.0  ;;  %v1878_v50 = vld [vmem:[%s4454_s0] sm:$0xff] }
 0x135   :  { %v2909_v62 = vpop.eup %1753  ;;  %v912_v30 = vsub.f32 1.5, %v911_v16  ;;  %vm944_vm7 = vweird.f32 %v2877_v2  ;;  %v2938_v12 = vadd.f32 1e-05, %v787_v55  ;;  %vm934_vm9 = vweird.f32 %v2879_v37 }
 0x136   :  { %v2914_v25 = vpop.eup %1755  ;;  %v923_v26 = vmul.f32 %v2864_v42, %v922_v38  ;;  %v949_v31 = vmul.f32 %v2909_v62, %v2870_v43  ;;  %v364_v56 = vpop.xlane.xlu2 %363  ;;  %v785_v38 = vmax.f32 %v721_v58, 0.0  ;;  %v1877_v58 = vld [vmem:[%s4454_s0 + $0x8] sm:$0xff]  ;;  %vm955_vm10 = vweird.f32 %v2909_v62 }
 0x137   :  { %v2923_v16 = vpop.eup %1757  ;;  %v913_v36 = vmul.f32 %v2873_v18, %v912_v30  ;;  %v939_v3 = vmul.f32 %v2914_v25, %v2877_v2  ;;  %v2950_v30 = vsel %vm75_vm0, %v325_v22, 0.0  ;;  %1759 = vrsqrt.f32 %v2938_v12  ;;  %v361_v19 = vpop.xlane.xlu1 %360  ;;  %vm956_vm13 = vmor %vm954_vm5, %vm955_vm10 }
 0x138   :  { %v927_v49 = vsel %vm926_vm6, %v2864_v42, %v923_v26  ;;  %v950_v0 = vmul.f32 %v2909_v62, %v949_v31  ;;  %v929_v1 = vmul.f32 %v2923_v16, %v2879_v37  ;;  %vm945_vm11 = vweird.f32 %v2914_v25  ;;  %v1881_v37 = vld [vmem:[%s4454_s0 + $0x10] sm:$0xff] }
 0x139   :  { %v1550_v42 = vmul.f32 %v1877_v58, %v927_v49  ;;  %v917_v55 = vsel %vm916_vm8, %v2873_v18, %v913_v36  ;;  %v940_v33 = vmul.f32 %v2914_v25, %v939_v3  ;;  %v2964_v58 = vadd.f32 1e-05, %v786_v32  ;;  %vm946_vm14 = vmor %vm944_vm7, %vm945_vm11 }
 0x13a   :  { %v1549_v26 = vmul.f32 %v1878_v50, %v917_v55  ;;  %v951_v31 = vmul.f32 0.5, %v950_v0  ;;  %v930_v22 = vmul.f32 %v2923_v16, %v929_v1  ;;  %v2966_v18 = vadd.f32 1e-05, %v785_v38  ;;  %v358_v50 = vpop.xlane.xlu0 %357 }
 0x13b   :  { %v1617_v63 = vmul.f32 %v2928_v13, %v1550_v42  ;;  %v941_v49 = vmul.f32 0.5, %v940_v33  ;;  %498 = vadd.xlane.f32.xlu2 %v2887_v24  ;;  %495 = vadd.xlane.f32.xlu1 %v2892_v7  ;;  %v598_v55 = vmul.f32 0.020833334, %v364_v56  ;;  %vm935_vm12 = vweird.f32 %v2923_v16 }
 0x13c   :  { %v1616_v36 = vmul.f32 %v2928_v13, %v1549_v26  ;;  %v952_v3 = vsub.f32 1.5, %v951_v31  ;;  %v931_v0 = vmul.f32 0.5, %v930_v22  ;;  %492 = vadd.xlane.f32.xlu0 %v2895_v20  ;;  %1761 = vrsqrt.f32 %v2964_v58  ;;  %vm936_vm15 = vmor %vm934_vm9, %vm935_vm12 }
 0x13d   :  { %1681 = vst.msk [vmem:[%s4456_s2 + $0x8] sm:$0xff] %vm75_vm0, %v1617_v63  ;;  %v942_v32 = vsub.f32 1.5, %v941_v49  ;;  %1763 = vrsqrt.f32 %v2966_v18  ;;  %v726_v20 = vsub.f32 %v598_v55, %v2660_v61  ;;  %v2986_v56 = vpop.eup %1759  ;;  %v597_v1 = vmul.f32 0.020833334, %v361_v19  ;;  %v1879_v19 = vld [vmem:[%s4454_s0 + $0x20] sm:$0xff]  ;;  %v1880_v49 = vld [vmem:[%s4454_s0 + $0x18] sm:$0xff] }
 0x13e   :  { %1680 = vst.msk [vmem:[%s4456_s2] sm:$0xff] %vm75_vm0, %v1616_v36  ;;  %v953_v24 = vmul.f32 %v2909_v62, %v952_v3  ;;  %v932_v7 = vsub.f32 1.5, %v931_v0  ;;  %v373_v63 = vpop.xlane.xlu2 %372  ;;  %v596_v42 = vmul.f32 0.020833334, %v358_v50  ;;  %v500_v33 = vsel %vm75_vm0, %v324_v54, 0.0 }
 0x13f   :  { %v943_v38 = vmul.f32 %v2914_v25, %v942_v32  ;;  %v979_v31 = vmul.f32 %v2986_v56, %v2938_v12  ;;  %v601_v43 = vmul.f32 0.020833334, %v373_v63  ;;  %v725_v2 = vsub.f32 %v597_v1, %v2663_v40  ;;  %v370_v63 = vpop.xlane.xlu1 %369 }
 0x140   :  { %v957_v26 = vsel %vm956_vm13, %v2909_v62, %v953_v24  ;;  %v933_v61 = vmul.f32 %v2923_v16, %v932_v7  ;;  %v790_v62 = vmax.f32 %v726_v20, 0.0  ;;  %v724_v55 = vsub.f32 %v596_v42, %v2651_v41 }
 0x141   :  { %v1553_v22 = vmul.f32 %v1879_v19, %v957_v26  ;;  %v947_v54 = vsel %vm946_vm14, %v2914_v25, %v943_v38  ;;  %v980_v0 = vmul.f32 %v2986_v56, %v979_v31  ;;  %v789_v24 = vmax.f32 %v725_v2, 0.0 }
 0x142   :  { %v1552_v36 = vmul.f32 %v1880_v49, %v947_v54  ;;  %v937_v3 = vsel %vm936_vm15, %v2923_v16, %v933_v61  ;;  %v3017_v25 = vpop.eup %1761  ;;  %v3023_v32 = vadd.f32 1e-05, %v790_v62  ;;  %vm984_vm1 = vweird.f32 %v2938_v12  ;;  %v367_v19 = vpop.xlane.xlu0 %366  ;;  %v1882_v12 = vld [vmem:[%s4454_s0 + $0x38] sm:$0xff] }
 0x143   :  { %v1620_v50 = vmul.f32 %v2928_v13, %v1553_v22  ;;  %v1551_v40 = vmul.f32 %v1881_v37, %v937_v3  ;;  %507 = vadd.xlane.f32.xlu2 %v2921_v8  ;;  %504 = vadd.xlane.f32.xlu1 %v2950_v30  ;;  %v3027_v16 = vpop.eup %1763  ;;  %v981_v7 = vmul.f32 0.5, %v980_v0  ;;  %v969_v20 = vmul.f32 %v3017_v25, %v2964_v58 }
 0x144   :  { %v1619_v41 = vmul.f32 %v2928_v13, %v1552_v36  ;;  %501 = vadd.xlane.f32.xlu0 %v500_v33  ;;  %vm974_vm2 = vweird.f32 %v2964_v58  ;;  %v959_v30 = vmul.f32 %v3027_v16, %v2966_v18  ;;  %1765 = vrsqrt.f32 %v3023_v32 }
 0x145   :  { %1684 = vst.msk [vmem:[%s4456_s2 + $0x20] sm:$0xff] %vm75_vm0, %v1620_v50  ;;  %v1618_v8 = vmul.f32 %v2928_v13, %v1551_v40  ;;  %v982_v38 = vsub.f32 1.5, %v981_v7  ;;  %vm985_vm3 = vweird.f32 %v2986_v56  ;;  %v970_v1 = vmul.f32 %v3017_v25, %v969_v20 }
 0x146   :  { %1683 = vst.msk [vmem:[%s4456_s2 + $0x18] sm:$0xff] %vm75_vm0, %v1619_v41  ;;  %v3048_v42 = vadd.f32 1e-05, %v789_v24  ;;  %v960_v33 = vmul.f32 %v3027_v16, %v959_v30  ;;  %v788_v26 = vmax.f32 %v724_v55, 0.0  ;;  %v729_v61 = vsub.f32 %v601_v43, %v2671_v53  ;;  %vm986_vm5 = vmor %vm984_vm1, %vm985_vm3  ;;  %v382_v3 = vpop.xlane.xlu2 %381 }
 0x147   :  { %1682 = vst.msk [vmem:[%s4456_s2 + $0x10] sm:$0xff] %vm75_vm0, %v1618_v8  ;;  %v600_v31 = vmul.f32 0.020833334, %v370_v63  ;;  %v983_v22 = vmul.f32 %v2986_v56, %v982_v38  ;;  %v971_v54 = vmul.f32 0.5, %v970_v1  ;;  %vm964_vm4 = vweird.f32 %v2966_v18  ;;  %v4561_v63 = vld [vmem:[#allocation23_spill] sm:$0xff]  ;;  %v379_v58 = vpop.xlane.xlu1 %378 }
 0x148   :  { %1767 = vrsqrt.f32 %v3048_v42  ;;  %v961_v62 = vmul.f32 0.5, %v960_v33  ;;  %v3061_v2 = vadd.f32 1e-05, %v788_v26  ;;  %v793_v49 = vmax.f32 %v729_v61, 0.0  ;;  %v1883_v33 = vld [vmem:[%s4454_s0 + $0x30] sm:$0xff]  ;;  %v1884_v61 = vld [vmem:[%s4454_s0 + $0x28] sm:$0xff] }
 0x149   :  { %v728_v36 = vsub.f32 %v600_v31, %v2673_v28  ;;  %v987_v53 = vsel %vm986_vm5, %v2986_v56, %v983_v22  ;;  %v972_v43 = vsub.f32 1.5, %v971_v54  ;;  %vm975_vm6 = vweird.f32 %v3017_v25 }
 0x14a   :  { %v599_v0 = vmul.f32 0.020833334, %v367_v19  ;;  %v3066_v55 = vpop.eup %1765  ;;  %v1556_v50 = vmul.f32 %v1882_v12, %v987_v53  ;;  %v962_v37 = vsub.f32 1.5, %v961_v62  ;;  %vm965_vm7 = vweird.f32 %v3027_v16  ;;  %vm976_vm8 = vmor %vm974_vm2, %vm975_vm6 }
 0x14b   :  { %1769 = vrsqrt.f32 %v3061_v2  ;;  %v973_v28 = vmul.f32 %v3017_v25, %v972_v43  ;;  %v1009_v56 = vmul.f32 %v3066_v55, %v3023_v32  ;;  %v3076_v40 = vadd.f32 1e-05, %v793_v49  ;;  %vm966_vm9 = vmor %vm964_vm4, %vm965_vm7 }
 0x14c   :  { %v604_v24 = vmul.f32 0.020833334, %v382_v3  ;;  %v1623_v41 = vmul.f32 %v2928_v13, %v1556_v50  ;;  %v963_v7 = vmul.f32 %v3027_v16, %v962_v37  ;;  %v792_v20 = vmax.f32 %v728_v36, 0.0 }
 0x14d   :  { %v727_v8 = vsub.f32 %v599_v0, %v4561_v63  ;;  %v977_v38 = vsel %vm976_vm8, %v3017_v25, %v973_v28  ;;  %v1010_v1 = vmul.f32 %v3066_v55, %v1009_v56  ;;  %vm1014_vm10 = vweird.f32 %v3023_v32 }
 0x14e   :  { %v3083_v30 = vpop.eup %1767  ;;  %1771 = vrsqrt.f32 %v3076_v40  ;;  %1687 = vst.msk [vmem:[%s4456_s2 + $0x38] sm:$0xff] %vm75_vm0, %v1623_v41  ;;  %v1555_v25 = vmul.f32 %v1883_v33, %v977_v38  ;;  %v967_v18 = vsel %vm966_vm9, %v3027_v16, %v963_v7  ;;  %vm1004_vm11 = vweird.f32 %v3048_v42 }
 0x14f   :  { %v999_v26 = vmul.f32 %v3083_v30, %v3048_v42  ;;  %v1554_v31 = vmul.f32 %v1884_v61, %v967_v18  ;;  %v1011_v19 = vmul.f32 0.5, %v1010_v1  ;;  %v3105_v22 = vadd.f32 1e-05, %v792_v20  ;;  %v376_v20 = vpop.xlane.xlu0 %375  ;;  %v1886_v42 = vld [vmem:[%s4454_s0 + $0x48] sm:$0xff] }
 0x150   :  { %v791_v54 = vmax.f32 %v727_v8, 0.0  ;;  %v1622_v49 = vmul.f32 %v2928_v13, %v1555_v25  ;;  %v732_v36 = vsub.f32 %v604_v24, %v2687_v60  ;;  %v603_v3 = vmul.f32 0.020833334, %v379_v58  ;;  %v3148_v25 = vpop.xlane.xlu2 %390 }
 0x151   :  { %v3107_v62 = vpop.eup %1769  ;;  %v1000_v16 = vmul.f32 %v3083_v30, %v999_v26  ;;  %v1621_v53 = vmul.f32 %v2928_v13, %v1554_v31  ;;  %v1012_v43 = vsub.f32 1.5, %v1011_v19  ;;  %vm1015_vm12 = vweird.f32 %v3066_v55 }
 0x152   :  { %v989_v0 = vmul.f32 %v3107_v62, %v3061_v2  ;;  %1686 = vst.msk [vmem:[%s4456_s2 + $0x30] sm:$0xff] %vm75_vm0, %v1622_v49  ;;  %vm994_vm13 = vweird.f32 %v3061_v2  ;;  %1773 = vrsqrt.f32 %v3105_v22  ;;  %v3122_v60 = vadd.f32 1e-05, %v791_v54  ;;  %vm1016_vm14 = vmor %vm1014_vm10, %vm1015_vm12  ;;  %v1887_v2 = vld [vmem:[%s4454_s0 + $0x40] sm:$0xff] }
 0x153   :  { %v1001_v12 = vmul.f32 0.5, %v1000_v16  ;;  %1685 = vst.msk [vmem:[%s4456_s2 + $0x28] sm:$0xff] %vm75_vm0, %v1621_v53  ;;  %v1013_v37 = vmul.f32 %v3066_v55, %v1012_v43  ;;  %v796_v56 = vmax.f32 %v732_v36, 0.0  ;;  %v731_v24 = vsub.f32 %v603_v3, %v2698_v39  ;;  %v1885_v39 = vld [vmem:[%s4454_s0 + $0x50] sm:$0xff]  ;;  %v3167_v3 = vpop.xlane.xlu1 %387 }
 0x154   :  { %v3124_v50 = vpop.eup %1771  ;;  %v990_v28 = vmul.f32 %v3107_v62, %v989_v0  ;;  %vm1005_vm15 = vweird.f32 %v3083_v30  ;;  %1775 = vrsqrt.f32 %v3122_v60  ;;  %vm1044_vm1 = vweird.f32 %v3076_v40  ;;  %v4562_v43 = vld [vmem:[#allocation24_spill] sm:$0xff] }
 0x155   :  { %v1002_v41 = vsub.f32 1.5, %v1001_v12  ;;  %v1039_v7 = vmul.f32 %v3124_v50, %v3076_v40  ;;  %v1017_v63 = vsel %vm1016_vm14, %v3066_v55, %v1013_v37  ;;  %v3141_v38 = vadd.f32 1e-05, %v796_v56  ;;  %vm1006_vm2 = vmor %vm1004_vm11, %vm1005_vm15 }
 0x156   :  { %v991_v8 = vmul.f32 0.5, %v990_v28  ;;  %v1559_v32 = vmul.f32 %v1885_v39, %v1017_v63  ;;  %v795_v33 = vmax.f32 %v731_v24, 0.0  ;;  %vm995_vm3 = vweird.f32 %v3107_v62 }
 0x157   :  { %v1003_v1 = vmul.f32 %v3083_v30, %v1002_v41  ;;  %v1040_v58 = vmul.f32 %v3124_v50, %v1039_v7  ;;  %1777 = vrsqrt.f32 %v3141_v38  ;;  %v602_v18 = vmul.f32 0.020833334, %v376_v20  ;;  %vm996_vm5 = vmor %vm994_vm13, %vm995_vm3 }
 0x158   :  { %v992_v55 = vsub.f32 1.5, %v991_v8  ;;  %v3154_v26 = vpop.eup %1773  ;;  %v1626_v61 = vmul.f32 %v2928_v13, %v1559_v32  ;;  %v3158_v54 = vadd.f32 1e-05, %v795_v33  ;;  %vm1034_vm4 = vweird.f32 %v3105_v22  ;;  %v1888_v8 = vld [vmem:[%s4454_s0 + $0x1e8] sm:$0xff]  ;;  %v1889_v32 = vld [vmem:[%s4454_s0 + $0x1e0] sm:$0xff] }
 0x159   :  { %v1007_v31 = vsel %vm1006_vm2, %v3083_v30, %v1003_v1  ;;  %v1041_v19 = vmul.f32 0.5, %v1040_v58  ;;  %v1029_v36 = vmul.f32 %v3154_v26, %v3105_v22  ;;  %vm1045_vm6 = vweird.f32 %v3124_v50 }
 0x15a   :  { %v1558_v49 = vmul.f32 %v1886_v42, %v1007_v31  ;;  %v993_v16 = vmul.f32 %v3107_v62, %v992_v55  ;;  %v3169_v53 = vpop.eup %1775  ;;  %1690 = vst.msk [vmem:[%s4456_s2 + $0x50] sm:$0xff] %vm75_vm0, %v1626_v61  ;;  %1779 = vrsqrt.f32 %v3158_v54  ;;  %v730_v0 = vsub.f32 %v602_v18, %v4562_v43  ;;  %vm1046_vm9 = vmor %vm1044_vm1, %vm1045_vm6  ;;  %v385_v55 = vpop.xlane.xlu0 %384  ;;  %v1890_v18 = vld [vmem:[%s4454_s0 + $0x68] sm:$0xff] }
 0x15b   :  { %v1042_v30 = vsub.f32 1.5, %v1041_v19  ;;  %v1030_v28 = vmul.f32 %v3154_v26, %v1029_v36  ;;  %v1019_v56 = vmul.f32 %v3169_v53, %v3122_v60  ;;  %vm1024_vm7 = vweird.f32 %v3122_v60  ;;  %v1894_v60 = vld [vmem:[%s4454_s0 + $0x58] sm:$0xff] }
 0x15c   :  { %v1625_v12 = vmul.f32 %v2928_v13, %v1558_v49  ;;  %v997_v37 = vsel %vm996_vm5, %v3107_v62, %v993_v16  ;;  %vm1035_vm8 = vweird.f32 %v3154_v26  ;;  %v794_v7 = vmax.f32 %v730_v0, 0.0  ;;  %v3233_v0 = vpop.xlane.xlu2 %399 }
 0x15d   :  { %v1557_v24 = vmul.f32 %v1887_v2, %v997_v37  ;;  %v1043_v41 = vmul.f32 %v3124_v50, %v1042_v30  ;;  %v3193_v20 = vpop.eup %1777  ;;  %v1031_v62 = vmul.f32 0.5, %v1030_v28  ;;  %v1020_v63 = vmul.f32 %v3169_v53, %v1019_v56  ;;  %v1891_v30 = vld [vmem:[%s4454_s0 + $0x1d8] sm:$0xff]  ;;  %vm1036_vm12 = vmor %vm1034_vm4, %vm1035_vm8 }
 0x15e   :  { %1689 = vst.msk [vmem:[%s4456_s2 + $0x48] sm:$0xff] %vm75_vm0, %v1625_v12  ;;  %v329_v39 = vmul.f32 %v1888_v8, %v1888_v8  ;;  %v328_v1 = vmul.f32 %v1889_v32, %v1889_v32  ;;  %vm1025_vm10 = vweird.f32 %v3169_v53  ;;  %v1069_v40 = vmul.f32 %v3193_v20, %v3141_v38 }
 0x15f   :  { %v1624_v58 = vmul.f32 %v2928_v13, %v1557_v24  ;;  %v1047_v33 = vsel %vm1046_vm9, %v3124_v50, %v1043_v41  ;;  %vm1074_vm11 = vweird.f32 %v3141_v38  ;;  %v1032_v31 = vsub.f32 1.5, %v1031_v62  ;;  %v397_v62 = vpop.xlane.xlu1 %396  ;;  %vm1026_vm15 = vmor %vm1024_vm7, %vm1025_vm10 }
 0x160   :  { %v1562_v61 = vmul.f32 %v1890_v18, %v1047_v33  ;;  %v1021_v19 = vmul.f32 0.5, %v1020_v63  ;;  %v3219_v42 = vadd.f32 1e-05, %v794_v7  ;;  %v3221_v49 = vpop.eup %1779  ;;  %v1070_v50 = vmul.f32 %v3193_v20, %v1069_v40  ;;  %v1892_v63 = vld [vmem:[%s4454_s0 + $0x60] sm:$0xff]  ;;  %v1893_v40 = vld [vmem:[%s4454_s0 + $0x1f8] sm:$0xff] }
 0x161   :  { %1688 = vst.msk [vmem:[%s4456_s2 + $0x40] sm:$0xff] %vm75_vm0, %v1624_v58  ;;  %v515_v16 = vsel %vm75_vm0, %v329_v39, 0.0  ;;  %v512_v36 = vsel %vm75_vm0, %v328_v1, 0.0  ;;  %v327_v43 = vmul.f32 %v1891_v30, %v1891_v30  ;;  %v1033_v37 = vmul.f32 %v3154_v26, %v1032_v31 }
 0x162   :  { %v1629_v12 = vmul.f32 %v2928_v13, %v1562_v61  ;;  %v1022_v28 = vsub.f32 1.5, %v1021_v19  ;;  %v1059_v56 = vmul.f32 %v3221_v49, %v3158_v54  ;;  %516 = vadd.xlane.f32.xlu2 %v515_v16  ;;  %513 = vadd.xlane.f32.xlu1 %v512_v36  ;;  %v1071_v2 = vmul.f32 0.5, %v1070_v50  ;;  %v4563_v19 = vld [vmem:[#allocation4_spill] sm:$0xff] }
 0x163   :  { %vm1075_vm13 = vweird.f32 %v3193_v20  ;;  %vm1065_vm14 = vweird.f32 %v3221_v49  ;;  %1781 = vrsqrt.f32 %v3219_v42  ;;  %v1037_v24 = vsel %vm1036_vm12, %v3154_v26, %v1033_v37  ;;  %v1896_v37 = vld [vmem:[%s4454_s0 + $0x80] sm:$0xff] }
 0x164   :  { %1693 = vst.msk [vmem:[%s4456_s2 + $0x68] sm:$0xff] %vm75_vm0, %v1629_v12  ;;  %v1023_v41 = vmul.f32 %v3169_v53, %v1022_v28  ;;  %v1060_v7 = vmul.f32 %v3221_v49, %v1059_v56  ;;  %v509_v22 = vsel %vm75_vm0, %v327_v43, 0.0  ;;  %v1561_v8 = vmul.f32 %v1892_v63, %v1037_v24  ;;  %vm1076_vm1 = vmor %vm1074_vm11, %vm1075_vm13  ;;  %v394_v12 = vpop.xlane.xlu0 %393 }
 0x165   :  { %v1072_v39 = vsub.f32 1.5, %v1071_v2  ;;  %510 = vadd.xlane.f32.xlu0 %v509_v22  ;;  %v607_v26 = vmul.f32 0.020833334, %v3148_v25  ;;  %v606_v32 = vmul.f32 0.020833334, %v3167_v3  ;;  %v331_v18 = vmul.f32 %v1893_v40, %v1893_v40  ;;  %v409_v22 = vpop.xlane.xlu2 %408 }
 0x166   :  { %v1027_v1 = vsel %vm1026_vm15, %v3169_v53, %v1023_v41  ;;  %v1061_v58 = vmul.f32 0.5, %v1060_v7  ;;  %v605_v33 = vmul.f32 0.020833334, %v385_v55  ;;  %v1628_v61 = vmul.f32 %v2928_v13, %v1561_v8 }
 0x167   :  { %v1560_v31 = vmul.f32 %v1894_v60, %v1027_v1  ;;  %v1073_v25 = vmul.f32 %v3193_v20, %v1072_v39  ;;  %v735_v3 = vsub.f32 %v607_v26, %v2705_v34  ;;  %v734_v55 = vsub.f32 %v606_v32, %v2707_v29  ;;  %v1895_v29 = vld [vmem:[%s4454_s0 + $0x1f0] sm:$0xff]  ;;  %v1897_v32 = vld [vmem:[%s4454_s0 + $0x78] sm:$0xff]  ;;  %v406_v40 = vpop.xlane.xlu1 %405 }
 0x168   :  { %v1062_v53 = vsub.f32 1.5, %v1061_v58  ;;  %v733_v50 = vsub.f32 %v605_v33, %v4563_v19  ;;  %v521_v16 = vsel %vm75_vm0, %v331_v18, 0.0  ;;  %1692 = vst.msk [vmem:[%s4456_s2 + $0x60] sm:$0xff] %vm75_vm0, %v1628_v61  ;;  %v330_v43 = vmul.f32 %v1895_v29, %v1895_v29  ;;  %v4564_v18 = vld [vmem:[#allocation5_spill] sm:$0xff]  ;;  %v4565_v19 = vld [vmem:[#allocation2_spill] sm:$0xff] }
 0x169   :  { %v3280_v36 = vpop.eup %1781  ;;  %v1627_v34 = vmul.f32 %v2928_v13, %v1560_v31  ;;  %v1077_v30 = vsel %vm1076_vm1, %v3193_v20, %v1073_v25  ;;  %v799_v38 = vmax.f32 %v735_v3, 0.0  ;;  %vm1064_vm2 = vweird.f32 %v3158_v54 }
 0x16a   :  { %v1565_v28 = vmul.f32 %v1896_v37, %v1077_v30  ;;  %v1063_v56 = vmul.f32 %v3221_v49, %v1062_v53  ;;  %v1049_v2 = vmul.f32 %v3280_v36, %v3219_v42  ;;  %522 = vadd.xlane.f32.xlu1 %v521_v16  ;;  %vm1066_vm3 = vmor %vm1064_vm2, %vm1065_vm14  ;;  %v798_v24 = vmax.f32 %v734_v55, 0.0 }
 0x16b   :  { %1691 = vst.msk [vmem:[%s4456_s2 + $0x58] sm:$0xff] %vm75_vm0, %v1627_v34  ;;  %v3304_v20 = vadd.f32 1e-05, %v799_v38  ;;  %v797_v41 = vmax.f32 %v733_v50, 0.0  ;;  %v518_v7 = vsel %vm75_vm0, %v330_v43, 0.0  ;;  %v3313_v26 = vmul.f32 %v2854_v44, %v2854_v44  ;;  %v4566_v38 = vld [vmem:[#allocation25_spill] sm:$0xff] }
 0x16c   :  { %v1632_v54 = vmul.f32 %v2928_v13, %v1565_v28  ;;  %v1067_v63 = vsel %vm1066_vm3, %v3221_v49, %v1063_v56  ;;  %v1050_v8 = vmul.f32 %v3280_v36, %v1049_v2  ;;  %v610_v39 = vmul.f32 0.020833334, %v3233_v0  ;;  %v1898_v56 = vld [vmem:[%s4454_s0 + $0x70] sm:$0xff] }
 0x16d   :  { %v1564_v1 = vmul.f32 %v1897_v32, %v1067_v63  ;;  %1783 = vrsqrt.f32 %v3304_v20  ;;  %v3319_v58 = vadd.f32 1e-05, %v798_v24  ;;  %519 = vadd.xlane.f32.xlu0 %v518_v7  ;;  %v3325_v0 = vadd.f32 1e-05, %v797_v41  ;;  %v418_v41 = vpop.xlane.xlu2 %417 }
 0x16e   :  { %1696 = vst.msk [vmem:[%s4456_s2 + $0x80] sm:$0xff] %vm75_vm0, %v1632_v54  ;;  %v1051_v49 = vmul.f32 0.5, %v1050_v8  ;;  %v738_v44 = vsub.f32 %v610_v39, %v2712_v48  ;;  %v609_v33 = vmul.f32 0.020833334, %v397_v62  ;;  %v3329_v61 = vmul.f32 0.020833334, %v4564_v18 }
 0x16f   :  { %v1631_v60 = vmul.f32 %v2928_v13, %v1564_v1  ;;  %1785 = vrsqrt.f32 %v3319_v58  ;;  %v608_v31 = vmul.f32 0.020833334, %v394_v12  ;;  %vm1055_vm4 = vweird.f32 %v3280_v36  ;;  %v403_v12 = vpop.xlane.xlu0 %402 }
 0x170   :  { %v1052_v25 = vsub.f32 1.5, %v1051_v49  ;;  %1787 = vrsqrt.f32 %v3325_v0  ;;  %v802_v3 = vmax.f32 %v738_v44, 0.0  ;;  %v737_v48 = vsub.f32 %v609_v33, %v2714_v9 }
 0x171   :  { %1695 = vst.msk [vmem:[%s4456_s2 + $0x78] sm:$0xff] %vm75_vm0, %v1631_v60  ;;  %v736_v62 = vsub.f32 %v608_v31, %v2703_v21  ;;  %v613_v53 = vmul.f32 0.020833334, %v409_v22  ;;  %v612_v55 = vmul.f32 0.020833334, %v406_v40  ;;  %vm1054_vm5 = vweird.f32 %v3219_v42 }
 0x172   :  { %v3342_v50 = vmul.f32 0.020833334, %v4565_v19  ;;  %v1053_v16 = vmul.f32 %v3280_v36, %v1052_v25  ;;  %v3346_v34 = vadd.f32 1e-05, %v802_v3  ;;  %v3351_v29 = vmul.f32 0.020833334, %v4566_v38  ;;  %vm1056_vm6 = vmor %vm1054_vm5, %vm1055_vm4 }
 0x173   :  { %v3348_v30 = vpop.eup %1783  ;;  %v801_v9 = vmax.f32 %v737_v48, 0.0  ;;  %v800_v43 = vmax.f32 %v736_v62, 0.0  ;;  %v741_v21 = vsub.f32 %v613_v53, %v2719_v5  ;;  %vm1104_vm7 = vweird.f32 %v3304_v20 }
 0x174   :  { %v1057_v37 = vsel %vm1056_vm6, %v3280_v36, %v1053_v16  ;;  %v1099_v28 = vmul.f32 %v3348_v30, %v3304_v20  ;;  %1789 = vrsqrt.f32 %v3346_v34  ;;  %v740_v36 = vsub.f32 %v612_v55, %v2725_v27 }
 0x175   :  { %v3359_v42 = vpop.eup %1785  ;;  %v1563_v2 = vmul.f32 %v1898_v56, %v1057_v37  ;;  %v3364_v24 = vadd.f32 1e-05, %v801_v9  ;;  %v3366_v5 = vadd.f32 1e-05, %v800_v43  ;;  %v805_v63 = vmax.f32 %v741_v21, 0.0 }
 0x176   :  { %v3369_v7 = vpop.eup %1787  ;;  %v1100_v22 = vmul.f32 %v3348_v30, %v1099_v28  ;;  %v1089_v54 = vmul.f32 %v3359_v42, %v3319_v58  ;;  %v611_v8 = vmul.f32 0.020833334, %v403_v12  ;;  %vm1094_vm8 = vweird.f32 %v3319_v58  ;;  %v1899_v12 = vld [vmem:[%s4454_s0 + $0x98] sm:$0xff] }
 0x177   :  { %v1630_v39 = vmul.f32 %v2928_v13, %v1563_v2  ;;  %v1079_v32 = vmul.f32 %v3369_v7, %v3325_v0  ;;  %1791 = vrsqrt.f32 %v3364_v24  ;;  %v616_v49 = vmul.f32 0.020833334, %v418_v41  ;;  %v415_v2 = vpop.xlane.xlu1 %414 }
 0x178   :  { %v1101_v27 = vmul.f32 0.5, %v1100_v22  ;;  %v1090_v1 = vmul.f32 %v3359_v42, %v1089_v54  ;;  %1793 = vrsqrt.f32 %v3366_v5  ;;  %vm1084_vm9 = vweird.f32 %v3325_v0  ;;  %v1901_v0 = vld [vmem:[%s4454_s0 + $0x88] sm:$0xff] }
 0x179   :  { %1694 = vst.msk [vmem:[%s4456_s2 + $0x70] sm:$0xff] %vm75_vm0, %v1630_v39  ;;  %v1080_v44 = vmul.f32 %v3369_v7, %v1079_v32  ;;  %v3387_v33 = vadd.f32 1e-05, %v805_v63  ;;  %v804_v40 = vmax.f32 %v740_v36, 0.0  ;;  %vm1105_vm10 = vweird.f32 %v3348_v30  ;;  %v1900_v63 = vld [vmem:[%s4454_s0 + $0x90] sm:$0xff]  ;;  %v412_v32 = vpop.xlane.xlu0 %411 }
 0x17a   :  { %v3389_v18 = vpop.eup %1789  ;;  %v1102_v60 = vsub.f32 1.5, %v1101_v27  ;;  %v1091_v31 = vmul.f32 0.5, %v1090_v1  ;;  %v739_v25 = vsub.f32 %v611_v8, %v2710_v4  ;;  %vm1095_vm11 = vweird.f32 %v3359_v42  ;;  %vm1106_vm13 = vmor %vm1104_vm7, %vm1105_vm10 }
 0x17b   :  { %v1081_v3 = vmul.f32 0.5, %v1080_v44  ;;  %v1129_v48 = vmul.f32 %v3389_v18, %v3346_v34  ;;  %vm1134_vm12 = vweird.f32 %v3346_v34  ;;  %1795 = vrsqrt.f32 %v3387_v33  ;;  %vm1096_vm2 = vmor %vm1094_vm8, %vm1095_vm11  ;;  %v1902_v34 = vld [vmem:[%s4454_s0 + $0xb0] sm:$0xff] }
 0x17c   :  { %v1103_v62 = vmul.f32 %v3348_v30, %v1102_v60  ;;  %v1092_v53 = vsub.f32 1.5, %v1091_v31  ;;  %v3399_v55 = vadd.f32 1e-05, %v804_v40  ;;  %v744_v19 = vsub.f32 %v616_v49, %v2732_v59 }
 0x17d   :  { %v3402_v16 = vpop.eup %1791  ;;  %v1082_v4 = vsub.f32 1.5, %v1081_v3  ;;  %vm1085_vm14 = vweird.f32 %v3369_v7  ;;  %v1130_v38 = vmul.f32 %v3389_v18, %v1129_v48  ;;  %vm1135_vm15 = vweird.f32 %v3389_v18 }
 0x17e   :  { %v3409_v9 = vpop.eup %1793  ;;  %v1107_v43 = vsel %vm1106_vm13, %v3348_v30, %v1103_v62  ;;  %v1093_v21 = vmul.f32 %v3359_v42, %v1092_v53  ;;  %v1119_v59 = vmul.f32 %v3402_v16, %v3364_v24  ;;  %vm1124_vm1 = vweird.f32 %v3364_v24  ;;  %vm1086_vm3 = vmor %vm1084_vm9, %vm1085_vm14  ;;  %v1903_v24 = vld [vmem:[%s4454_s0 + $0xa8] sm:$0xff] }
 0x17f   :  { %v803_v20 = vmax.f32 %v739_v25, 0.0  ;;  %v1568_v37 = vmul.f32 %v1899_v12, %v1107_v43  ;;  %v1083_v30 = vmul.f32 %v3369_v7, %v1082_v4  ;;  %v1131_v28 = vmul.f32 0.5, %v1130_v38  ;;  %vm1136_vm6 = vmor %vm1134_vm12, %vm1135_vm15 }
 0x180   :  { %v1109_v56 = vmul.f32 %v3409_v9, %v3366_v5  ;;  %v1097_v36 = vsel %vm1096_vm2, %v3359_v42, %v1093_v21  ;;  %v1120_v41 = vmul.f32 %v3402_v16, %v1119_v59  ;;  %1797 = vrsqrt.f32 %v3399_v55 }
 0x181   :  { %v808_v58 = vmax.f32 %v744_v19, 0.0  ;;  %v3433_v22 = vpop.eup %1795  ;;  %v1635_v54 = vmul.f32 %v2928_v13, %v1568_v37  ;;  %v1567_v8 = vmul.f32 %v1900_v63, %v1097_v36  ;;  %v1087_v42 = vsel %vm1086_vm3, %v3369_v7, %v1083_v30  ;;  %v427_v30 = vpop.xlane.xlu2 %426  ;;  %v1904_v63 = vld [vmem:[%s4454_s0 + $0xa0] sm:$0xff] }
 0x182   :  { %v1132_v39 = vsub.f32 1.5, %v1131_v28  ;;  %v1566_v27 = vmul.f32 %v1901_v0, %v1087_v42  ;;  %v1121_v1 = vmul.f32 0.5, %v1120_v41  ;;  %v1110_v49 = vmul.f32 %v3409_v9, %v1109_v56  ;;  %v421_v0 = vpop.xlane.xlu0 %420 }
 0x183   :  { %v1159_v44 = vmul.f32 %v3433_v22, %v3387_v33  ;;  %1699 = vst.msk [vmem:[%s4456_s2 + $0x98] sm:$0xff] %vm75_vm0, %v1635_v54  ;;  %v1634_v7 = vmul.f32 %v2928_v13, %v1567_v8  ;;  %vm1125_vm4 = vweird.f32 %v3402_v16  ;;  %vm1114_vm5 = vweird.f32 %v3366_v5 }
 0x184   :  { %v1133_v40 = vmul.f32 %v3389_v18, %v1132_v39  ;;  %v1633_v60 = vmul.f32 %v2928_v13, %v1566_v27  ;;  %v1122_v31 = vsub.f32 1.5, %v1121_v1  ;;  %v1111_v25 = vmul.f32 0.5, %v1110_v49  ;;  %vm1126_vm8 = vmor %vm1124_vm1, %vm1125_vm4  ;;  %v1905_v49 = vld [vmem:[%s4454_s0 + $0xc8] sm:$0xff] }
 0x185   :  { %v1160_v3 = vmul.f32 %v3433_v22, %v1159_v44  ;;  %1698 = vst.msk [vmem:[%s4456_s2 + $0x90] sm:$0xff] %vm75_vm0, %v1634_v7  ;;  %vm1115_vm7 = vweird.f32 %v3409_v9  ;;  %v3466_v62 = vadd.f32 1e-05, %v803_v20  ;;  %v3468_v53 = vadd.f32 1e-05, %v808_v58 }
 0x186   :  { %v1137_v48 = vsel %vm1136_vm6, %v3389_v18, %v1133_v40  ;;  %v3470_v19 = vpop.eup %1797  ;;  %1697 = vst.msk [vmem:[%s4456_s2 + $0x88] sm:$0xff] %vm75_vm0, %v1633_v60  ;;  %v1123_v18 = vmul.f32 %v3402_v16, %v1122_v31  ;;  %v1112_v38 = vsub.f32 1.5, %v1111_v25  ;;  %vm1164_vm9 = vweird.f32 %v3387_v33  ;;  %vm1116_vm11 = vmor %vm1114_vm5, %vm1115_vm7 }
 0x187   :  { %v1571_v4 = vmul.f32 %v1902_v34, %v1137_v48  ;;  %v1161_v43 = vmul.f32 0.5, %v1160_v3  ;;  %vm1165_vm10 = vweird.f32 %v3433_v22  ;;  %v1149_v21 = vmul.f32 %v3470_v19, %v3399_v55 }
 0x188   :  { %1799 = vrsqrt.f32 %v3466_v62  ;;  %v1127_v20 = vsel %vm1126_vm8, %v3402_v16, %v1123_v18  ;;  %v1113_v12 = vmul.f32 %v3409_v9, %v1112_v38  ;;  %vm1155_vm12 = vweird.f32 %v3470_v19  ;;  %v424_v16 = vpop.xlane.xlu1 %423  ;;  %vm1166_vm13 = vmor %vm1164_vm9, %vm1165_vm10 }
 0x189   :  { %v1638_v59 = vmul.f32 %v2928_v13, %v1571_v4  ;;  %v1162_v37 = vsub.f32 1.5, %v1161_v43  ;;  %v1570_v28 = vmul.f32 %v1903_v24, %v1127_v20  ;;  %v1150_v56 = vmul.f32 %v3470_v19, %v1149_v21  ;;  %v1906_v43 = vld [vmem:[%s4454_s0 + $0xc0] sm:$0xff] }
 0x18a   :  { %1801 = vrsqrt.f32 %v3468_v53  ;;  %v1117_v36 = vsel %vm1116_vm11, %v3409_v9, %v1113_v12  ;;  %v615_v58 = vmul.f32 0.020833334, %v415_v2  ;;  %v614_v54 = vmul.f32 0.020833334, %v412_v32  ;;  %v436_v12 = vpop.xlane.xlu2 %435 }
 0x18b   :  { %1702 = vst.msk [vmem:[%s4456_s2 + $0xb0] sm:$0xff] %vm75_vm0, %v1638_v59  ;;  %v1163_v41 = vmul.f32 %v3433_v22, %v1162_v37  ;;  %v1637_v5 = vmul.f32 %v2928_v13, %v1570_v28  ;;  %v1569_v8 = vmul.f32 %v1904_v63, %v1117_v36  ;;  %v1151_v42 = vmul.f32 0.5, %v1150_v56 }
 0x18c   :  { %v619_v39 = vmul.f32 0.020833334, %v427_v30  ;;  %v743_v2 = vsub.f32 %v615_v58, %v2741_v35  ;;  %v742_v32 = vsub.f32 %v614_v54, %v2717_v46  ;;  %v618_v27 = vmul.f32 0.020833334, %v424_v16  ;;  %v4567_v54 = vld [vmem:[#allocation7_spill] sm:$0xff] }
 0x18d   :  { %v1167_v9 = vsel %vm1166_vm13, %v3433_v22, %v1163_v41  ;;  %1701 = vst.msk [vmem:[%s4456_s2 + $0xa8] sm:$0xff] %vm75_vm0, %v1637_v5  ;;  %v1636_v33 = vmul.f32 %v2928_v13, %v1569_v8  ;;  %v1152_v22 = vsub.f32 1.5, %v1151_v42  ;;  %vm1154_vm14 = vweird.f32 %v3399_v55  ;;  %v430_v41 = vpop.xlane.xlu0 %429 }
 0x18e   :  { %v3519_v1 = vpop.eup %1799  ;;  %v1574_v44 = vmul.f32 %v1905_v49, %v1167_v9  ;;  %v747_v35 = vsub.f32 %v619_v39, %v2757_v15  ;;  %v807_v7 = vmax.f32 %v743_v2, 0.0  ;;  %v806_v40 = vmax.f32 %v742_v32, 0.0  ;;  %vm1156_vm15 = vmor %vm1154_vm14, %vm1155_vm12  ;;  %v1907_v32 = vld [vmem:[%s4454_s0 + $0xb8] sm:$0xff] }
 0x18f   :  { %v1139_v46 = vmul.f32 %v3519_v1, %v3466_v62  ;;  %1700 = vst.msk [vmem:[%s4456_s2 + $0xa0] sm:$0xff] %vm75_vm0, %v1636_v33  ;;  %v1153_v25 = vmul.f32 %v3470_v19, %v1152_v22  ;;  %v746_v15 = vsub.f32 %v618_v27, %v2759_v14  ;;  %v3544_v55 = vmul.f32 %v3329_v61, %v3329_v61 }
 0x190   :  { %v3533_v60 = vpop.eup %1801  ;;  %v1641_v31 = vmul.f32 %v2928_v13, %v1574_v44  ;;  %v811_v3 = vmax.f32 %v747_v35, 0.0  ;;  %v3551_v4 = vadd.f32 1e-05, %v807_v7  ;;  %v3558_v18 = vadd.f32 1e-05, %v806_v40  ;;  %v433_v30 = vpop.xlane.xlu1 %432 }
 0x191   :  { %v1140_v48 = vmul.f32 %v3519_v1, %v1139_v46  ;;  %v1189_v34 = vmul.f32 %v3533_v60, %v3468_v53  ;;  %v1157_v14 = vsel %vm1156_vm15, %v3470_v19, %v1153_v25  ;;  %v810_v38 = vmax.f32 %v746_v15, 0.0  ;;  %v3620_v35 = vld [vmem:[%s4455_s1] ss:$0 sm:$0xff] }
 0x192   :  { %1705 = vst.msk [vmem:[%s4456_s2 + $0xc8] sm:$0xff] %vm75_vm0, %v1641_v31  ;;  %v3560_v61 = vadd.f32 1e-05, %v811_v3  ;;  %v1573_v21 = vmul.f32 %v1906_v43, %v1157_v14  ;;  %1803 = vrsqrt.f32 %v3551_v4  ;;  %v3569_v37 = vmul.f32 %v3342_v50, %v3342_v50 }
 0x193   :  { %v1141_v59 = vmul.f32 0.5, %v1140_v48  ;;  %v1190_v20 = vmul.f32 %v3533_v60, %v1189_v34  ;;  %v3572_v19 = vmul.f32 0.020833334, %v2737_v45  ;;  %vm1145_vm1 = vweird.f32 %v3519_v1 }
 0x194   :  { %1805 = vrsqrt.f32 %v3558_v18  ;;  %v1640_v24 = vmul.f32 %v2928_v13, %v1573_v21  ;;  %vm1144_vm2 = vweird.f32 %v3466_v62  ;;  %v3579_v16 = vadd.f32 1e-05, %v810_v38  ;;  %v4568_v62 = vld [vmem:[#allocation26_spill] sm:$0xff] }
 0x195   :  { %v1142_v28 = vsub.f32 1.5, %v1141_v59  ;;  %v1191_v56 = vmul.f32 0.5, %v1190_v20  ;;  %1807 = vrsqrt.f32 %v3560_v61  ;;  %v617_v50 = vmul.f32 0.020833334, %v421_v0  ;;  %vm1146_vm4 = vmor %vm1144_vm2, %vm1145_vm1 }
 0x196   :  { %v622_v36 = vmul.f32 0.020833334, %v436_v12  ;;  %1704 = vst.msk [vmem:[%s4456_s2 + $0xc0] sm:$0xff] %vm75_vm0, %v1640_v24  ;;  %vm1195_vm3 = vweird.f32 %v3533_v60  ;;  %v621_v13 = vmul.f32 0.020833334, %v433_v30  ;;  %1809 = vrsqrt.f32 %v3579_v16 }
 0x197   :  { %v1143_v45 = vmul.f32 %v3519_v1, %v1142_v28  ;;  %v1192_v58 = vsub.f32 1.5, %v1191_v56  ;;  %v3588_v5 = vmul.f32 0.020833334, %v4567_v54  ;;  %v745_v63 = vsub.f32 %v617_v50, %v4568_v62 }
 0x198   :  { %v750_v8 = vsub.f32 %v622_v36, %v2765_v11  ;;  %v3595_v42 = vpop.eup %1803  ;;  %vm1194_vm5 = vweird.f32 %v3468_v53  ;;  %v620_v9 = vmul.f32 0.020833334, %v430_v41  ;;  %vm1184_vm7 = vweird.f32 %v3551_v4 }
 0x199   :  { %v1147_v39 = vsel %vm1146_vm4, %v3519_v1, %v1143_v45  ;;  %v1193_v0 = vmul.f32 %v3533_v60, %v1192_v58  ;;  %vm1196_vm6 = vmor %vm1194_vm5, %vm1195_vm3  ;;  %v1179_v11 = vmul.f32 %v3595_v42, %v3551_v4  ;;  %v809_v1 = vmax.f32 %v745_v63, 0.0 }
 0x19a   :  { %v3600_v2 = vpop.eup %1805  ;;  %v1572_v27 = vmul.f32 %v1907_v32, %v1147_v39  ;;  %v749_v33 = vsub.f32 %v621_v13, %v2767_v57  ;;  %vm1174_vm8 = vweird.f32 %v3558_v18  ;;  %v814_v22 = vmax.f32 %v750_v8, 0.0  ;;  %v1909_v57 = vld [vmem:[%s4454_s0 + $0xe0] sm:$0xff]  ;;  %v442_v13 = vpop.xlane.xlu1 %441  ;;  %v1910_v8 = vld [vmem:[%s4454_s0 + $0xd8] sm:$0xff]  ;;  %v1911_v32 = vld [vmem:[%s4454_s0 + $0xd0] sm:$0xff] }
 0x19b   :  { %v3611_v53 = vpop.eup %1807  ;;  %v1197_v49 = vsel %vm1196_vm6, %v3533_v60, %v1193_v0  ;;  %v1169_v44 = vmul.f32 %v3600_v2, %v3558_v18  ;;  %v1180_v40 = vmul.f32 %v3595_v42, %v1179_v11  ;;  %vm1224_vm9 = vweird.f32 %v3560_v61 }
 0x19c   :  { %v1639_v46 = vmul.f32 %v3620_v35, %v1572_v27  ;;  %v1577_v7 = vmul.f32 %v1909_v57, %v1197_v49  ;;  %v1219_v60 = vmul.f32 %v3611_v53, %v3560_v61  ;;  %v3631_v25 = vadd.f32 1e-05, %v809_v1  ;;  %v3636_v48 = vpop.eup %1809  ;;  %v1912_v61 = vld [vmem:[%s4454_s0 + $0xf8] sm:$0xff] }
 0x19d   :  { %v1170_v31 = vmul.f32 %v3600_v2, %v1169_v44  ;;  %v3633_v3 = vadd.f32 1e-05, %v814_v22  ;;  %v748_v15 = vsub.f32 %v620_v9, %v2752_v47  ;;  %v1181_v14 = vmul.f32 0.5, %v1180_v40  ;;  %v445_v47 = vpop.xlane.xlu2 %444  ;;  %v439_v22 = vpop.xlane.xlu0 %438 }
 0x19e   :  { %1703 = vst.msk [vmem:[%s4456_s2 + $0xb8] sm:$0xff] %vm75_vm0, %v1639_v46  ;;  %v1644_v34 = vmul.f32 %v3620_v35, %v1577_v7  ;;  %v1220_v38 = vmul.f32 %v3611_v53, %v1219_v60  ;;  %v813_v43 = vmax.f32 %v749_v33, 0.0  ;;  %vm1185_vm10 = vweird.f32 %v3595_v42 }
 0x19f   :  { %v1171_v21 = vmul.f32 0.5, %v1170_v31  ;;  %v1209_v59 = vmul.f32 %v3636_v48, %v3579_v16  ;;  %1811 = vrsqrt.f32 %v3631_v25  ;;  %v1182_v20 = vsub.f32 1.5, %v1181_v14  ;;  %vm1186_vm13 = vmor %vm1184_vm7, %vm1185_vm10  ;;  %v1913_v31 = vld [vmem:[%s4454_s0 + $0xf0] sm:$0xff] }
 0x1a0   :  { %1708 = vst.msk [vmem:[%s4456_s2 + $0xe0] sm:$0xff] %vm75_vm0, %v1644_v34  ;;  %vm1175_vm11 = vweird.f32 %v3600_v2  ;;  %v1221_v12 = vmul.f32 0.5, %v1220_v38  ;;  %1813 = vrsqrt.f32 %v3633_v3  ;;  %vm1225_vm12 = vweird.f32 %v3611_v53 }
 0x1a1   :  { %v1172_v30 = vsub.f32 1.5, %v1171_v21  ;;  %v1210_v24 = vmul.f32 %v3636_v48, %v1209_v59  ;;  %v3656_v28 = vadd.f32 1e-05, %v813_v43  ;;  %v1183_v56 = vmul.f32 %v3595_v42, %v1182_v20  ;;  %vm1176_vm15 = vmor %vm1174_vm8, %vm1175_vm11 }
 0x1a2   :  { %v1222_v50 = vsub.f32 1.5, %v1221_v12  ;;  %v812_v36 = vmax.f32 %v748_v15, 0.0  ;;  %v625_v41 = vmul.f32 0.020833334, %v445_v47  ;;  %vm1214_vm14 = vweird.f32 %v3579_v16  ;;  %vm1226_vm2 = vmor %vm1224_vm9, %vm1225_vm12 }
 0x1a3   :  { %v1173_v45 = vmul.f32 %v3600_v2, %v1172_v30  ;;  %v1211_v58 = vmul.f32 0.5, %v1210_v24  ;;  %1815 = vrsqrt.f32 %v3656_v28  ;;  %v1187_v54 = vsel %vm1186_vm13, %v3595_v42, %v1183_v56 }
 0x1a4   :  { %v1223_v62 = vmul.f32 %v3611_v53, %v1222_v50  ;;  %vm1215_vm1 = vweird.f32 %v3636_v48  ;;  %v3673_v4 = vadd.f32 1e-05, %v812_v36  ;;  %v1576_v39 = vmul.f32 %v1910_v8, %v1187_v54  ;;  %v451_v36 = vpop.xlane.xlu1 %450 }
 0x1a5   :  { %v3675_v63 = vpop.eup %1811  ;;  %v1177_v42 = vsel %vm1176_vm15, %v3600_v2, %v1173_v45  ;;  %v1212_v18 = vsub.f32 1.5, %v1211_v58  ;;  %v753_v0 = vsub.f32 %v625_v41, %v2772_v51  ;;  %v624_v1 = vmul.f32 0.020833334, %v442_v13  ;;  %vm1216_vm3 = vmor %vm1214_vm14, %vm1215_vm1  ;;  %v454_v60 = vpop.xlane.xlu2 %453 }
 0x1a6   :  { %v3686_v9 = vpop.eup %1813  ;;  %v1575_v27 = vmul.f32 %v1911_v32, %v1177_v42  ;;  %v1227_v11 = vsel %vm1226_vm2, %v3611_v53, %v1223_v62  ;;  %v1199_v2 = vmul.f32 %v3675_v63, %v3631_v25  ;;  %v1643_v33 = vmul.f32 %v3620_v35, %v1576_v39 }
 0x1a7   :  { %v1580_v51 = vmul.f32 %v1912_v61, %v1227_v11  ;;  %v1213_v49 = vmul.f32 %v3636_v48, %v1212_v18  ;;  %v1249_v44 = vmul.f32 %v3686_v9, %v3633_v3  ;;  %vm1204_vm4 = vweird.f32 %v3631_v25  ;;  %v1914_v25 = vld [vmem:[%s4454_s0 + $0xe8] sm:$0xff] }
 0x1a8   :  { %v1642_v46 = vmul.f32 %v3620_v35, %v1575_v27  ;;  %v1200_v53 = vmul.f32 %v3675_v63, %v1199_v2  ;;  %1817 = vrsqrt.f32 %v3673_v4  ;;  %1707 = vst.msk [vmem:[%s4456_s2 + $0xd8] sm:$0xff] %vm75_vm0, %v1643_v33  ;;  %vm1205_vm5 = vweird.f32 %v3675_v63 }
 0x1a9   :  { %v3709_v57 = vpop.eup %1815  ;;  %v1647_v7 = vmul.f32 %v3620_v35, %v1580_v51  ;;  %v1217_v40 = vsel %vm1216_vm3, %v3636_v48, %v1213_v49  ;;  %v1250_v16 = vmul.f32 %v3686_v9, %v1249_v44  ;;  %vm1255_vm6 = vweird.f32 %v3686_v9  ;;  %vm1206_vm9 = vmor %vm1204_vm4, %vm1205_vm5 }
 0x1aa   :  { %1706 = vst.msk [vmem:[%s4456_s2 + $0xd0] sm:$0xff] %vm75_vm0, %v1642_v46  ;;  %v1579_v15 = vmul.f32 %v1913_v31, %v1217_v40  ;;  %v1201_v34 = vmul.f32 0.5, %v1200_v53  ;;  %v1239_v48 = vmul.f32 %v3709_v57, %v3656_v28  ;;  %v817_v38 = vmax.f32 %v753_v0, 0.0 }
 0x1ab   :  { %1711 = vst.msk [vmem:[%s4456_s2 + $0xf8] sm:$0xff] %vm75_vm0, %v1647_v7  ;;  %v1251_v14 = vmul.f32 0.5, %v1250_v16  ;;  %v752_v43 = vsub.f32 %v624_v1, %v2778_v10  ;;  %v623_v21 = vmul.f32 0.020833334, %v439_v22  ;;  %v628_v12 = vmul.f32 0.020833334, %v454_v60 }
 0x1ac   :  { %v1646_v59 = vmul.f32 %v3620_v35, %v1579_v15  ;;  %v1202_v47 = vsub.f32 1.5, %v1201_v34  ;;  %v1240_v20 = vmul.f32 %v3709_v57, %v1239_v48  ;;  %v3736_v24 = vadd.f32 1e-05, %v817_v38  ;;  %v1916_v22 = vld [vmem:[%s4454_s0 + $0x108] sm:$0xff]  ;;  %v4569_v34 = vld [vmem:[#allocation8_spill] sm:$0xff]  ;;  %v460_v38 = vpop.xlane.xlu1 %459 }
 0x1ad   :  { %v1252_v30 = vsub.f32 1.5, %v1251_v14  ;;  %v816_v56 = vmax.f32 %v752_v43, 0.0  ;;  %v751_v50 = vsub.f32 %v623_v21, %v2763_v23  ;;  %vm1254_vm7 = vweird.f32 %v3633_v3  ;;  %v463_v44 = vpop.xlane.xlu2 %462 }
 0x1ae   :  { %v3739_v41 = vpop.eup %1817  ;;  %1710 = vst.msk [vmem:[%s4456_s2 + $0xf0] sm:$0xff] %vm75_vm0, %v1646_v59  ;;  %v1203_v10 = vmul.f32 %v3675_v63, %v1202_v47  ;;  %v1241_v45 = vmul.f32 0.5, %v1240_v20  ;;  %vm1245_vm8 = vweird.f32 %v3709_v57  ;;  %1819 = vrsqrt.f32 %v3736_v24  ;;  %vm1256_vm10 = vmor %vm1254_vm7, %vm1255_vm6  ;;  %v1917_v59 = vld [vmem:[%s4454_s0 + $0x100] sm:$0xff] }
 0x1af   :  { %v1253_v23 = vmul.f32 %v3686_v9, %v1252_v30  ;;  %v1229_v58 = vmul.f32 %v3739_v41, %v3673_v4  ;;  %v756_v13 = vsub.f32 %v628_v12, %v2782_v17  ;;  %v3760_v62 = vadd.f32 1e-05, %v816_v56  ;;  %v448_v17 = vpop.xlane.xlu0 %447 }
 0x1b0   :  { %v1207_v54 = vsel %vm1206_vm9, %v3675_v63, %v1203_v10  ;;  %v1242_v3 = vsub.f32 1.5, %v1241_v45  ;;  %v627_v8 = vmul.f32 0.020833334, %v451_v36  ;;  %v815_v0 = vmax.f32 %v751_v50, 0.0  ;;  %v1915_v63 = vld [vmem:[%s4454_s0 + $0x110] sm:$0xff]  ;;  %v4570_v50 = vld [vmem:[#allocation11_spill] sm:$0xff] }
 0x1b1   :  { %v1578_v39 = vmul.f32 %v1914_v25, %v1207_v54  ;;  %v1257_v42 = vsel %vm1256_vm10, %v3686_v9, %v1253_v23  ;;  %v1230_v18 = vmul.f32 %v3739_v41, %v1229_v58  ;;  %vm1244_vm11 = vweird.f32 %v3656_v28 }
 0x1b2   :  { %v1583_v32 = vmul.f32 %v1915_v63, %v1257_v42  ;;  %v1243_v27 = vmul.f32 %v3709_v57, %v1242_v3  ;;  %1821 = vrsqrt.f32 %v3760_v62  ;;  %vm1246_vm12 = vmor %vm1244_vm11, %vm1245_vm8  ;;  %v3776_v2 = vadd.f32 1e-05, %v815_v0 }
 0x1b3   :  { %v1645_v11 = vmul.f32 %v3620_v35, %v1578_v39  ;;  %v1231_v9 = vmul.f32 0.5, %v1230_v18  ;;  %v820_v1 = vmax.f32 %v756_v13, 0.0  ;;  %v755_v51 = vsub.f32 %v627_v8, %v2786_v52  ;;  %v4571_v39 = vld [vmem:[#allocation31_spill] sm:$0xff] }
 0x1b4   :  { %v1650_v33 = vmul.f32 %v3620_v35, %v1583_v32  ;;  %v1247_v61 = vsel %vm1246_vm12, %v3709_v57, %v1243_v27  ;;  %v626_v49 = vmul.f32 0.020833334, %v448_v17  ;;  %v3781_v28 = vpop.eup %1819  ;;  %vm1235_vm13 = vweird.f32 %v3739_v41 }
 0x1b5   :  { %1709 = vst.msk [vmem:[%s4456_s2 + $0xe8] sm:$0xff] %vm75_vm0, %v1645_v11  ;;  %v1582_v46 = vmul.f32 %v1916_v22, %v1247_v61  ;;  %v1232_v53 = vsub.f32 1.5, %v1231_v9  ;;  %1823 = vrsqrt.f32 %v3776_v2  ;;  %vm1234_vm14 = vweird.f32 %v3673_v4 }
 0x1b6   :  { %1714 = vst.msk [vmem:[%s4456_s2 + $0x110] sm:$0xff] %vm75_vm0, %v1650_v33  ;;  %v1279_v52 = vmul.f32 %v3781_v28, %v3736_v24  ;;  %v3799_v57 = vadd.f32 1e-05, %v820_v1  ;;  %v819_v7 = vmax.f32 %v755_v51, 0.0  ;;  %v754_v60 = vsub.f32 %v626_v49, %v2770_v6  ;;  %vm1236_vm15 = vmor %vm1234_vm14, %vm1235_vm13  ;;  %v4572_v1 = vld [vmem:[#allocation3_spill] sm:$0xff] }
 0x1b7   :  { %v1649_v40 = vmul.f32 %v3620_v35, %v1582_v46  ;;  %v1233_v16 = vmul.f32 %v3739_v41, %v1232_v53  ;;  %v631_v31 = vmul.f32 0.020833334, %v463_v44  ;;  %v3807_v48 = vmul.f32 0.020833334, %v4569_v34  ;;  %v457_v10 = vpop.xlane.xlu0 %456 }
 0x1b8   :  { %v3804_v15 = vpop.eup %1821  ;;  %v1280_v4 = vmul.f32 %v3781_v28, %v1279_v52  ;;  %1825 = vrsqrt.f32 %v3799_v57  ;;  %v3811_v14 = vadd.f32 1e-05, %v819_v7  ;;  %vm1284_vm1 = vweird.f32 %v3736_v24  ;;  %v1918_v24 = vld [vmem:[%s4454_s0 + $0x128] sm:$0xff] }
 0x1b9   :  { %1713 = vst.msk [vmem:[%s4456_s2 + $0x108] sm:$0xff] %vm75_vm0, %v1649_v40  ;;  %v1237_v6 = vsel %vm1236_vm15, %v3739_v41, %v1233_v16  ;;  %v1269_v43 = vmul.f32 %v3804_v15, %v3760_v62  ;;  %v818_v21 = vmax.f32 %v754_v60, 0.0  ;;  %vm1274_vm2 = vweird.f32 %v3760_v62  ;;  %v472_v40 = vpop.xlane.xlu2 %471  ;;  %v1919_v62 = vld [vmem:[%s4454_s0 + $0x120] sm:$0xff] }
 0x1ba   :  { %v1581_v47 = vmul.f32 %v1917_v59, %v1237_v6  ;;  %v1281_v20 = vmul.f32 0.5, %v1280_v4  ;;  %1827 = vrsqrt.f32 %v3811_v14  ;;  %v759_v36 = vsub.f32 %v631_v31, %v4570_v50  ;;  %v469_v6 = vpop.xlane.xlu1 %468 }
 0x1bb   :  { %v3826_v12 = vpop.eup %1823  ;;  %v1270_v30 = vmul.f32 %v3804_v15, %v1269_v43  ;;  %v3829_v56 = vadd.f32 1e-05, %v818_v21  ;;  %v630_v41 = vmul.f32 0.020833334, %v460_v38  ;;  %vm1285_vm3 = vweird.f32 %v3781_v28 }
 0x1bc   :  { %v1648_v45 = vmul.f32 %v3620_v35, %v1581_v47  ;;  %v1282_v23 = vsub.f32 1.5, %v1281_v20  ;;  %v1259_v58 = vmul.f32 %v3826_v12, %v3776_v2  ;;  %vm1264_vm4 = vweird.f32 %v3776_v2  ;;  %vm1286_vm5 = vmor %vm1284_vm1, %vm1285_vm3 }
 0x1bd   :  { %v1271_v13 = vmul.f32 0.5, %v1270_v30  ;;  %1829 = vrsqrt.f32 %v3829_v56  ;;  %v823_v54 = vmax.f32 %v759_v36, 0.0  ;;  %v758_v42 = vsub.f32 %v630_v41, %v4571_v39  ;;  %v1920_v30 = vld [vmem:[%s4454_s0 + $0x118] sm:$0xff] }
 0x1be   :  { %v3838_v3 = vpop.eup %1825  ;;  %1712 = vst.msk [vmem:[%s4456_s2 + $0x100] sm:$0xff] %vm75_vm0, %v1648_v45  ;;  %v1283_v8 = vmul.f32 %v3781_v28, %v1282_v23  ;;  %v1260_v25 = vmul.f32 %v3826_v12, %v1259_v58  ;;  %v629_v18 = vmul.f32 0.020833334, %v457_v10  ;;  %vm1275_vm6 = vweird.f32 %v3804_v15  ;;  %v4573_v45 = vld [vmem:[#allocation13_spill] sm:$0xff] }
 0x1bf   :  { %v1272_v0 = vsub.f32 1.5, %v1271_v13  ;;  %v1309_v17 = vmul.f32 %v3838_v3, %v3799_v57  ;;  %vm1314_vm7 = vweird.f32 %v3799_v57  ;;  %v3853_v63 = vadd.f32 1e-05, %v823_v54  ;;  %vm1276_vm8 = vmor %vm1274_vm2, %vm1275_vm6  ;;  %v466_v20 = vpop.xlane.xlu0 %465  ;;  %v1921_v57 = vld [vmem:[%s4454_s0 + $0x140] sm:$0xff] }
 0x1c0   :  { %v3855_v32 = vpop.eup %1827  ;;  %v1287_v27 = vsel %vm1286_vm5, %v3781_v28, %v1283_v8  ;;  %v1261_v11 = vmul.f32 0.5, %v1260_v25  ;;  %v822_v9 = vmax.f32 %v758_v42, 0.0  ;;  %v757_v33 = vsub.f32 %v629_v18, %v4572_v1 }
 0x1c1   :  { %v1586_v61 = vmul.f32 %v1918_v24, %v1287_v27  ;;  %v1273_v51 = vmul.f32 %v3804_v15, %v1272_v0  ;;  %v1310_v49 = vmul.f32 %v3838_v3, %v1309_v17  ;;  %v1299_v44 = vmul.f32 %v3855_v32, %v3811_v14  ;;  %v1922_v0 = vld [vmem:[%s4454_s0 + $0x138] sm:$0xff]  ;;  %v481_v24 = vpop.xlane.xlu2 %480 }
 0x1c2   :  { %v1262_v28 = vsub.f32 1.5, %v1261_v11  ;;  %vm1265_vm9 = vweird.f32 %v3826_v12  ;;  %vm1315_vm10 = vweird.f32 %v3838_v3  ;;  %1831 = vrsqrt.f32 %v3853_v63 }
 0x1c3   :  { %v3871_v22 = vpop.eup %1829  ;;  %v1653_v46 = vmul.f32 %v3620_v35, %v1586_v61  ;;  %v1277_v53 = vsel %vm1276_vm8, %v3804_v15, %v1273_v51  ;;  %v1311_v52 = vmul.f32 0.5, %v1310_v49  ;;  %v1300_v7 = vmul.f32 %v3855_v32, %v1299_v44  ;;  %vm1266_vm12 = vmor %vm1264_vm4, %vm1265_vm9  ;;  %v1923_v49 = vld [vmem:[%s4454_s0 + $0x130] sm:$0xff] }
 0x1c4   :  { %v1585_v16 = vmul.f32 %v1919_v62, %v1277_v53  ;;  %v1263_v60 = vmul.f32 %v3826_v12, %v1262_v28  ;;  %vm1305_vm11 = vweird.f32 %v3855_v32  ;;  %v1289_v31 = vmul.f32 %v3871_v22, %v3829_v56  ;;  %vm1316_vm13 = vmor %vm1314_vm7, %vm1315_vm10 }
 0x1c5   :  { %1717 = vst.msk [vmem:[%s4456_s2 + $0x128] sm:$0xff] %vm75_vm0, %v1653_v46  ;;  %v1312_v15 = vsub.f32 1.5, %v1311_v52  ;;  %v1301_v34 = vmul.f32 0.5, %v1300_v7  ;;  %v3891_v4 = vadd.f32 1e-05, %v822_v9  ;;  %v821_v38 = vmax.f32 %v757_v33, 0.0  ;;  %v478_v46 = vpop.xlane.xlu1 %477 }
 0x1c6   :  { %v1652_v43 = vmul.f32 %v3620_v35, %v1585_v16  ;;  %v1267_v21 = vsel %vm1266_vm12, %v3826_v12, %v1263_v60  ;;  %v1290_v59 = vmul.f32 %v3871_v22, %v1289_v31  ;;  %v634_v47 = vmul.f32 0.020833334, %v472_v40  ;;  %v4574_v52 = vld [vmem:[#allocation33_spill] sm:$0xff]  ;;  %v4575_v40 = vld [vmem:[#allocation10_spill] sm:$0xff] }
 0x1c7   :  { %v1584_v2 = vmul.f32 %v1920_v30, %v1267_v21  ;;  %v1313_v50 = vmul.f32 %v3838_v3, %v1312_v15  ;;  %v1302_v36 = vsub.f32 1.5, %v1301_v34  ;;  %1833 = vrsqrt.f32 %v3891_v4  ;;  %v475_v60 = vpop.xlane.xlu0 %474  ;;  %v4576_v21 = vld [vmem:[#allocation14_spill] sm:$0xff] }
 0x1c8   :  { %v3901_v41 = vpop.eup %1831  ;;  %1716 = vst.msk [vmem:[%s4456_s2 + $0x120] sm:$0xff] %vm75_vm0, %v1652_v43  ;;  %vm1304_vm14 = vweird.f32 %v3811_v14  ;;  %v1291_v12 = vmul.f32 0.5, %v1290_v59  ;;  %v3912_v10 = vadd.f32 1e-05, %v821_v38  ;;  %v762_v23 = vsub.f32 %v634_v47, %v4573_v45 }
 0x1c9   :  { %v1651_v58 = vmul.f32 %v3620_v35, %v1584_v2  ;;  %v1317_v13 = vsel %vm1316_vm13, %v3838_v3, %v1313_v50  ;;  %v1303_v54 = vmul.f32 %v3855_v32, %v1302_v36  ;;  %v1339_v8 = vmul.f32 %v3901_v41, %v3853_v63  ;;  %vm1306_vm15 = vmor %vm1304_vm14, %vm1305_vm11 }
 0x1ca   :  { %v1589_v25 = vmul.f32 %v1921_v57, %v1317_v13  ;;  %v1292_v14 = vsub.f32 1.5, %v1291_v12  ;;  %vm1295_vm1 = vweird.f32 %v3871_v22  ;;  %1835 = vrsqrt.f32 %v3912_v10 }
 0x1cb   :  { %1715 = vst.msk [vmem:[%s4456_s2 + $0x118] sm:$0xff] %vm75_vm0, %v1651_v58  ;;  %v1307_v3 = vsel %vm1306_vm15, %v3855_v32, %v1303_v54  ;;  %vm1294_vm2 = vweird.f32 %v3829_v56  ;;  %v1340_v39 = vmul.f32 %v3901_v41, %v1339_v8  ;;  %v826_v42 = vmax.f32 %v762_v23, 0.0  ;;  %v4577_v54 = vld [vmem:[#allocation9_spill] sm:$0xff]  ;;  %v4578_v8 = vld [vmem:[#allocation32_spill] sm:$0xff] }
 0x1cc   :  { %v1656_v18 = vmul.f32 %v3620_v35, %v1589_v25  ;;  %v1588_v17 = vmul.f32 %v1922_v0, %v1307_v3  ;;  %v1293_v27 = vmul.f32 %v3871_v22, %v1292_v14  ;;  %v633_v11 = vmul.f32 0.020833334, %v469_v6  ;;  %vm1296_vm3 = vmor %vm1294_vm2, %vm1295_vm1 }
 0x1cd   :  { %v3939_v9 = vpop.eup %1833  ;;  %v3943_v32 = vmul.f32 %v3351_v29, %v3351_v29  ;;  %v1341_v56 = vmul.f32 0.5, %v1340_v39  ;;  %v3945_v1 = vadd.f32 1e-05, %v826_v42  ;;  %v632_v33 = vmul.f32 0.020833334, %v466_v20  ;;  %v490_v42 = vpop.xlane.xlu2 %489 }
 0x1ce   :  { %1720 = vst.msk [vmem:[%s4456_s2 + $0x140] sm:$0xff] %vm75_vm0, %v1656_v18  ;;  %v1655_v61 = vmul.f32 %v3620_v35, %v1588_v17  ;;  %v1297_v51 = vsel %vm1296_vm3, %v3871_v22, %v1293_v27  ;;  %vm1344_vm4 = vweird.f32 %v3853_v63  ;;  %v1329_v29 = vmul.f32 %v3939_v9, %v3891_v4  ;;  %v1924_v63 = vld [vmem:[%s4454_s0 + $0x158] sm:$0xff]  ;;  %v1925_v17 = vld [vmem:[%s4454_s0 + $0x150] sm:$0xff] }
 0x1cf   :  { %v1587_v44 = vmul.f32 %v1923_v49, %v1297_v51  ;;  %v1342_v28 = vsub.f32 1.5, %v1341_v56  ;;  %vm1345_vm5 = vweird.f32 %v3901_v41  ;;  %1837 = vrsqrt.f32 %v3945_v1  ;;  %v484_v51 = vpop.xlane.xlu0 %483 }
 0x1d0   :  { %v3961_v53 = vpop.eup %1835  ;;  %1719 = vst.msk [vmem:[%s4456_s2 + $0x138] sm:$0xff] %vm75_vm0, %v1655_v61  ;;  %v1330_v22 = vmul.f32 %v3939_v9, %v1329_v29  ;;  %v761_v7 = vsub.f32 %v633_v11, %v4574_v52  ;;  %v760_v62 = vsub.f32 %v632_v33, %v4575_v40  ;;  %v637_v16 = vmul.f32 0.020833334, %v481_v24  ;;  %vm1346_vm7 = vmor %vm1344_vm4, %vm1345_vm5  ;;  %v487_v24 = vpop.xlane.xlu1 %486  ;;  %v4579_v52 = vld [vmem:[#allocation36_spill] sm:$0xff] }
 0x1d1   :  { %v1654_v31 = vmul.f32 %v3620_v35, %v1587_v44  ;;  %v1343_v15 = vmul.f32 %v3901_v41, %v1342_v28  ;;  %vm1335_vm6 = vweird.f32 %v3939_v9  ;;  %v1319_v34 = vmul.f32 %v3961_v53, %v3912_v10 }
 0x1d2   :  { %v1331_v38 = vmul.f32 0.5, %v1330_v22  ;;  %v825_v6 = vmax.f32 %v761_v7, 0.0  ;;  %v824_v43 = vmax.f32 %v760_v62, 0.0  ;;  %v765_v59 = vsub.f32 %v637_v16, %v4576_v21  ;;  %v4580_v21 = vld [vmem:[#allocation27_spill] sm:$0xff] }
 0x1d3   :  { %1718 = vst.msk [vmem:[%s4456_s2 + $0x130] sm:$0xff] %vm75_vm0, %v1654_v31  ;;  %v1347_v47 = vsel %vm1346_vm7, %v3901_v41, %v1343_v15  ;;  %v1320_v20 = vmul.f32 %v3961_v53, %v1319_v34  ;;  %v636_v30 = vmul.f32 0.020833334, %v478_v46  ;;  %v635_v2 = vmul.f32 0.020833334, %v475_v60 }
 0x1d4   :  { %v1592_v50 = vmul.f32 %v1924_v63, %v1347_v47  ;;  %v1332_v36 = vsub.f32 1.5, %v1331_v38  ;;  %v3987_v12 = vadd.f32 1e-05, %v825_v6  ;;  %v3989_v45 = vadd.f32 1e-05, %v824_v43  ;;  %v4581_v47 = vld [vmem:[#allocation34_spill] sm:$0xff] }
 0x1d5   :  { %v3991_v23 = vpop.eup %1837  ;;  %v1321_v58 = vmul.f32 0.5, %v1320_v20  ;;  %v829_v13 = vmax.f32 %v765_v59, 0.0  ;;  %v764_v41 = vsub.f32 %v636_v30, %v4577_v54  ;;  %v763_v57 = vsub.f32 %v635_v2, %v4578_v8  ;;  %v1927_v30 = vld [vmem:[%s4454_s0 + $0x170] sm:$0xff] }
 0x1d6   :  { %v1659_v25 = vmul.f32 %v3620_v35, %v1592_v50  ;;  %v1333_v14 = vmul.f32 %v3939_v9, %v1332_v36  ;;  %vm1334_vm8 = vweird.f32 %v3891_v4  ;;  %v1369_v3 = vmul.f32 %v3991_v23, %v3945_v1  ;;  %v499_v36 = vpop.xlane.xlu2 %498 }
 0x1d7   :  { %vm1336_vm9 = vmor %vm1334_vm8, %vm1335_vm6  ;;  %v1322_v39 = vsub.f32 1.5, %v1321_v58  ;;  %vm1324_vm10 = vweird.f32 %v3912_v10  ;;  %vm1325_vm11 = vweird.f32 %v3961_v53  ;;  %1839 = vrsqrt.f32 %v3987_v12  ;;  %v1926_v10 = vld [vmem:[%s4454_s0 + $0x148] sm:$0xff] }
 0x1d8   :  { %1723 = vst.msk [vmem:[%s4456_s2 + $0x158] sm:$0xff] %vm75_vm0, %v1659_v25  ;;  %v1337_v4 = vsel %vm1336_vm9, %v3939_v9, %v1333_v14  ;;  %v1370_v18 = vmul.f32 %v3991_v23, %v1369_v3  ;;  %1841 = vrsqrt.f32 %v3989_v45  ;;  %v4012_v0 = vadd.f32 1e-05, %v829_v13  ;;  %vm1326_vm12 = vmor %vm1324_vm10, %vm1325_vm11 }
 0x1d9   :  { %v1591_v27 = vmul.f32 %v1925_v17, %v1337_v4  ;;  %v1323_v11 = vmul.f32 %v3961_v53, %v1322_v39  ;;  %v828_v56 = vmax.f32 %v764_v41, 0.0  ;;  %v827_v33 = vmax.f32 %v763_v57, 0.0 }
 0x1da   :  { %v1371_v9 = vmul.f32 0.5, %v1370_v18  ;;  %vm1375_vm13 = vweird.f32 %v3991_v23  ;;  %1843 = vrsqrt.f32 %v4012_v0  ;;  %v640_v61 = vmul.f32 0.020833334, %v490_v42 }
 0x1db   :  { %v1658_v29 = vmul.f32 %v3620_v35, %v1591_v27  ;;  %v1327_v49 = vsel %vm1326_vm12, %v3961_v53, %v1323_v11  ;;  %v4024_v44 = vadd.f32 1e-05, %v828_v56  ;;  %v4026_v28 = vadd.f32 1e-05, %v827_v33 }
 0x1dc   :  { %v1590_v46 = vmul.f32 %v1926_v10, %v1327_v49  ;;  %v1372_v22 = vsub.f32 1.5, %v1371_v9  ;;  %v768_v7 = vsub.f32 %v640_v61, %v4579_v52  ;;  %v639_v40 = vmul.f32 0.020833334, %v487_v24  ;;  %v496_v9 = vpop.xlane.xlu1 %495  ;;  %v1928_v49 = vld [vmem:[%s4454_s0 + $0x168] sm:$0xff]  ;;  %v4582_v52 = vld [vmem:[#allocation28_spill] sm:$0xff] }
 0x1dd   :  { %v4032_v62 = vpop.eup %1839  ;;  %v4036_v16 = vmul.f32 %v3572_v19, %v3572_v19  ;;  %1722 = vst.msk [vmem:[%s4456_s2 + $0x150] sm:$0xff] %vm75_vm0, %v1658_v29  ;;  %vm1374_vm14 = vweird.f32 %v3945_v1  ;;  %1845 = vrsqrt.f32 %v4024_v44  ;;  %v638_v53 = vmul.f32 0.020833334, %v484_v51 }
 0x1de   :  { %v4044_v60 = vpop.eup %1841  ;;  %v1657_v31 = vmul.f32 %v3620_v35, %v1590_v46  ;;  %v1373_v15 = vmul.f32 %v3991_v23, %v1372_v22  ;;  %v1359_v19 = vmul.f32 %v4032_v62, %v3987_v12  ;;  %vm1364_vm15 = vweird.f32 %v3987_v12  ;;  %vm1376_vm1 = vmor %vm1374_vm14, %vm1375_vm13 }
 0x1df   :  { %v1349_v1 = vmul.f32 %v4044_v60, %v3989_v45  ;;  %vm1354_vm2 = vweird.f32 %v3989_v45  ;;  %1847 = vrsqrt.f32 %v4026_v28  ;;  %v832_v34 = vmax.f32 %v768_v7, 0.0  ;;  %v1929_v45 = vld [vmem:[%s4454_s0 + $0x160] sm:$0xff] }
 0x1e0   :  { %v4057_v38 = vpop.eup %1843  ;;  %1721 = vst.msk [vmem:[%s4456_s2 + $0x148] sm:$0xff] %vm75_vm0, %v1657_v31  ;;  %v1377_v6 = vsel %vm1376_vm1, %v3991_v23, %v1373_v15  ;;  %v1360_v43 = vmul.f32 %v4032_v62, %v1359_v19  ;;  %v767_v59 = vsub.f32 %v639_v40, %v4580_v21  ;;  %v766_v20 = vsub.f32 %v638_v53, %v4581_v47 }
 0x1e1   :  { %v1595_v2 = vmul.f32 %v1927_v30, %v1377_v6  ;;  %v1350_v63 = vmul.f32 %v4044_v60, %v1349_v1  ;;  %v1399_v50 = vmul.f32 %v4057_v38, %v4012_v0  ;;  %vm1404_vm3 = vweird.f32 %v4012_v0  ;;  %v1930_v0 = vld [vmem:[%s4454_s0 + $0x188] sm:$0xff] }
 0x1e2   :  { %v1361_v23 = vmul.f32 0.5, %v1360_v43  ;;  %vm1365_vm4 = vweird.f32 %v4032_v62  ;;  %v4075_v58 = vadd.f32 1e-05, %v832_v34  ;;  %v831_v13 = vmax.f32 %v767_v59, 0.0 }
 0x1e3   :  { %v4077_v54 = vpop.eup %1845  ;;  %v1662_v41 = vmul.f32 %v3620_v35, %v1595_v2  ;;  %v1351_v8 = vmul.f32 0.5, %v1350_v63  ;;  %v1400_v57 = vmul.f32 %v4057_v38, %v1399_v50  ;;  %v830_v25 = vmax.f32 %v766_v20, 0.0  ;;  %vm1366_vm9 = vmor %vm1364_vm15, %vm1365_vm4  ;;  %v1931_v50 = vld [vmem:[%s4454_s0 + $0x180] sm:$0xff] }
 0x1e4   :  { %v1362_v14 = vsub.f32 1.5, %v1361_v23  ;;  %v1389_v3 = vmul.f32 %v4077_v54, %v4024_v44  ;;  %vm1394_vm5 = vweird.f32 %v4024_v44  ;;  %1849 = vrsqrt.f32 %v4075_v58 }
 0x1e5   :  { %v643_v39 = vmul.f32 0.020833334, %v499_v36  ;;  %v4085_v42 = vpop.eup %1847  ;;  %1726 = vst.msk [vmem:[%s4456_s2 + $0x170] sm:$0xff] %vm75_vm0, %v1662_v41  ;;  %v1352_v4 = vsub.f32 1.5, %v1351_v8  ;;  %vm1355_vm6 = vweird.f32 %v4044_v60  ;;  %v1401_v18 = vmul.f32 0.5, %v1400_v57 }
 0x1e6   :  { %v4092_v17 = vadd.f32 1e-05, %v831_v13  ;;  %v1363_v27 = vmul.f32 %v4032_v62, %v1362_v14  ;;  %vm1405_vm7 = vweird.f32 %v4057_v38  ;;  %v1390_v11 = vmul.f32 %v4077_v54, %v1389_v3  ;;  %vm1356_vm11 = vmor %vm1354_vm2, %vm1355_vm6  ;;  %v1932_v3 = vld [vmem:[%s4454_s0 + $0x178] sm:$0xff] }
 0x1e7   :  { %v1379_v56 = vmul.f32 %v4085_v42, %v4026_v28  ;;  %vm1384_vm8 = vweird.f32 %v4026_v28  ;;  %v1353_v33 = vmul.f32 %v4044_v60, %v1352_v4  ;;  %v1402_v24 = vsub.f32 1.5, %v1401_v18  ;;  %vm1406_vm12 = vmor %vm1404_vm3, %vm1405_vm7 }
 0x1e8   :  { %vm1395_vm10 = vweird.f32 %v4077_v54  ;;  %1851 = vrsqrt.f32 %v4092_v17  ;;  %v1367_v61 = vsel %vm1366_vm9, %v4032_v62, %v1363_v27  ;;  %v1391_v51 = vmul.f32 0.5, %v1390_v11  ;;  %v505_v27 = vpop.xlane.xlu1 %504 }
 0x1e9   :  { %v1380_v29 = vmul.f32 %v4085_v42, %v1379_v56  ;;  %v4113_v12 = vadd.f32 1e-05, %v830_v25  ;;  %v1594_v10 = vmul.f32 %v1928_v49, %v1367_v61  ;;  %v1357_v46 = vsel %vm1356_vm11, %v4044_v60, %v1353_v33  ;;  %v493_v60 = vpop.xlane.xlu0 %492  ;;  %vm1396_vm14 = vmor %vm1394_vm5, %vm1395_vm10  ;;  %v508_v25 = vpop.xlane.xlu2 %507 }
 0x1ea   :  { %v1403_v22 = vmul.f32 %v4057_v38, %v1402_v24  ;;  %v771_v7 = vsub.f32 %v643_v39, %v4582_v52  ;;  %v4121_v40 = vpop.eup %1849  ;;  %v1593_v62 = vmul.f32 %v1929_v45, %v1357_v46  ;;  %v1392_v53 = vsub.f32 1.5, %v1391_v51 }
 0x1eb   :  { %v1381_v31 = vmul.f32 0.5, %v1380_v29  ;;  %1853 = vrsqrt.f32 %v4113_v12  ;;  %v1661_v15 = vmul.f32 %v3620_v35, %v1594_v10  ;;  %vm1385_vm13 = vweird.f32 %v4085_v42 }
 0x1ec   :  { %v1407_v19 = vsel %vm1406_vm12, %v4057_v38, %v1403_v22  ;;  %v1429_v1 = vmul.f32 %v4121_v40, %v4075_v58  ;;  %v1660_v34 = vmul.f32 %v3620_v35, %v1593_v62  ;;  %v1393_v43 = vmul.f32 %v4077_v54, %v1392_v53  ;;  %vm1386_vm1 = vmor %vm1384_vm8, %vm1385_vm13 }
 0x1ed   :  { %v1598_v6 = vmul.f32 %v1930_v0, %v1407_v19  ;;  %v1382_v21 = vsub.f32 1.5, %v1381_v31  ;;  %1725 = vst.msk [vmem:[%s4456_s2 + $0x168] sm:$0xff] %vm75_vm0, %v1661_v15  ;;  %vm1434_vm15 = vweird.f32 %v4075_v58  ;;  %v835_v47 = vmax.f32 %v771_v7, 0.0  ;;  %v1933_v58 = vld [vmem:[%s4454_s0 + $0x1a0] sm:$0xff] }
 0x1ee   :  { %v4141_v59 = vpop.eup %1851  ;;  %v1430_v38 = vmul.f32 %v4121_v40, %v1429_v1  ;;  %v642_v20 = vmul.f32 0.020833334, %v496_v9  ;;  %1724 = vst.msk [vmem:[%s4456_s2 + $0x160] sm:$0xff] %vm75_vm0, %v1660_v34  ;;  %v1397_v2 = vsel %vm1396_vm14, %v4077_v54, %v1393_v43  ;;  %vm1435_vm2 = vweird.f32 %v4121_v40  ;;  %v4583_v9 = vld [vmem:[#allocation35_spill] sm:$0xff] }
 0x1ef   :  { %v1665_v30 = vmul.f32 %v3620_v35, %v1598_v6  ;;  %v1383_v63 = vmul.f32 %v4085_v42, %v1382_v21  ;;  %v1419_v44 = vmul.f32 %v4141_v59, %v4092_v17  ;;  %v1597_v36 = vmul.f32 %v1931_v50, %v1397_v2  ;;  %vm1436_vm5 = vmor %vm1434_vm15, %vm1435_vm2  ;;  %v4584_v6 = vld [vmem:[#allocation6_spill] sm:$0xff] }
 0x1f0   :  { %v1431_v23 = vmul.f32 0.5, %v1430_v38  ;;  %v4170_v13 = vadd.f32 1e-05, %v835_v47  ;;  %v770_v57 = vsub.f32 %v642_v20, %v3313_v26  ;;  %v641_v28 = vmul.f32 0.020833334, %v493_v60 }
 0x1f1   :  { %v4172_v54 = vpop.eup %1853  ;;  %1729 = vst.msk [vmem:[%s4456_s2 + $0x188] sm:$0xff] %vm75_vm0, %v1665_v30  ;;  %v1387_v41 = vsel %vm1386_vm1, %v4085_v42, %v1383_v63  ;;  %v1420_v8 = vmul.f32 %v4141_v59, %v1419_v44  ;;  %v1664_v14 = vmul.f32 %v3620_v35, %v1597_v36  ;;  %vm1424_vm3 = vweird.f32 %v4092_v17  ;;  %v502_v49 = vpop.xlane.xlu0 %501  ;;  %v1934_v17 = vld [vmem:[%s4454_s0 + $0x198] sm:$0xff]  ;;  %v4585_v30 = vld [vmem:[#allocation16_spill] sm:$0xff] }
 0x1f2   :  { %v1596_v39 = vmul.f32 %v1932_v3, %v1387_v41  ;;  %v1432_v4 = vsub.f32 1.5, %v1431_v23  ;;  %v1409_v18 = vmul.f32 %v4172_v54, %v4113_v12  ;;  %vm1425_vm4 = vweird.f32 %v4141_v59  ;;  %v517_v38 = vpop.xlane.xlu2 %516  ;;  %v1935_v44 = vld [vmem:[%s4454_s0 + $0x190] sm:$0xff] }
 0x1f3   :  { %v1421_v11 = vmul.f32 0.5, %v1420_v8  ;;  %1855 = vrsqrt.f32 %v4170_v13  ;;  %1728 = vst.msk [vmem:[%s4456_s2 + $0x180] sm:$0xff] %vm75_vm0, %v1664_v14  ;;  %v834_v33 = vmax.f32 %v770_v57, 0.0  ;;  %v769_v61 = vsub.f32 %v641_v28, %v4583_v9  ;;  %vm1426_vm7 = vmor %vm1424_vm3, %vm1425_vm4  ;;  %v514_v57 = vpop.xlane.xlu1 %513 }
 0x1f4   :  { %v1663_v26 = vmul.f32 %v3620_v35, %v1596_v39  ;;  %v1433_v42 = vmul.f32 %v4121_v40, %v1432_v4  ;;  %v1410_v56 = vmul.f32 %v4172_v54, %v1409_v18  ;;  %v646_v51 = vmul.f32 0.020833334, %v508_v25 }
 0x1f5   :  { %v1422_v24 = vsub.f32 1.5, %v1421_v11  ;;  %v645_v29 = vmul.f32 0.020833334, %v505_v27  ;;  %vm1415_vm6 = vweird.f32 %v4172_v54  ;;  %v4208_v22 = vadd.f32 1e-05, %v834_v33 }
 0x1f6   :  { %1727 = vst.msk [vmem:[%s4456_s2 + $0x178] sm:$0xff] %vm75_vm0, %v1663_v26  ;;  %v1437_v10 = vsel %vm1436_vm5, %v4121_v40, %v1433_v42  ;;  %v1411_v46 = vmul.f32 0.5, %v1410_v56  ;;  %v833_v45 = vmax.f32 %v769_v61, 0.0  ;;  %v774_v62 = vsub.f32 %v646_v51, %v3569_v37 }
 0x1f7   :  { %v1601_v52 = vmul.f32 %v1933_v58, %v1437_v10  ;;  %v1423_v7 = vmul.f32 %v4141_v59, %v1422_v24  ;;  %1857 = vrsqrt.f32 %v4208_v22  ;;  %v773_v53 = vsub.f32 %v645_v29, %v3943_v32 }
 0x1f8   :  { %v1412_v40 = vsub.f32 1.5, %v1411_v46  ;;  %v644_v31 = vmul.f32 0.020833334, %v502_v49  ;;  %v4225_v1 = vadd.f32 1e-05, %v833_v45  ;;  %v838_v37 = vmax.f32 %v774_v62, 0.0 }
 0x1f9   :  { %v4221_v60 = vpop.eup %1855  ;;  %v1668_v15 = vmul.f32 %v3620_v35, %v1601_v52  ;;  %v1427_v19 = vsel %vm1426_vm7, %v4141_v59, %v1423_v7  ;;  %vm1414_vm8 = vweird.f32 %v4113_v12  ;;  %v587_v43 = vmul.f32 0.020833334, %v4584_v6  ;;  %v511_v27 = vpop.xlane.xlu0 %510  ;;  %v1936_v49 = vld [vmem:[%s4454_s0 + $0x1b8] sm:$0xff] }
 0x1fa   :  { %v1600_v34 = vmul.f32 %v1934_v17, %v1427_v19  ;;  %v1413_v0 = vmul.f32 %v4172_v54, %v1412_v40  ;;  %v1459_v32 = vmul.f32 %v4221_v60, %v4170_v13  ;;  %vm1416_vm9 = vmor %vm1414_vm8, %vm1415_vm6  ;;  %1859 = vrsqrt.f32 %v4225_v1  ;;  %v4311_v40 = vld [vmem:[%s4455_s1] ss:$0 sm:$0xff] }
 0x1fb   :  { %1732 = vst.msk [vmem:[%s4456_s2 + $0x1a0] sm:$0xff] %vm75_vm0, %v1668_v15  ;;  %v4242_v21 = vadd.f32 1e-05, %v838_v37  ;;  %v837_v59 = vmax.f32 %v773_v53, 0.0  ;;  %v772_v2 = vsub.f32 %v644_v31, %v4585_v30  ;;  %v713_v63 = vmul.f32 %v3588_v5, %v3588_v5 }
 0x1fc   :  { %v1667_v12 = vmul.f32 %v3620_v35, %v1600_v34  ;;  %v1417_v47 = vsel %vm1416_vm9, %v4172_v54, %v1413_v0  ;;  %v1460_v20 = vmul.f32 %v4221_v60, %v1459_v32  ;;  %v712_v54 = vmul.f32 %v3807_v48, %v3807_v48  ;;  %v1938_v32 = vld [vmem:[%s4454_s0 + $0x1b0] sm:$0xff] }
 0x1fd   :  { %v1599_v50 = vmul.f32 %v1935_v44, %v1417_v47  ;;  %1861 = vrsqrt.f32 %v4242_v21  ;;  %v4254_v36 = vadd.f32 1e-05, %v837_v59  ;;  %v4256_v23 = vpop.eup %1857  ;;  %v836_v41 = vmax.f32 %v772_v2, 0.0 }
 0x1fe   :  { %1731 = vst.msk [vmem:[%s4456_s2 + $0x198] sm:$0xff] %vm75_vm0, %v1667_v12  ;;  %v1461_v5 = vmul.f32 0.5, %v1460_v20  ;;  %v649_v8 = vmul.f32 0.020833334, %v517_v38  ;;  %v4264_v28 = vmul.f32 %v587_v43, %v587_v43  ;;  %v1449_v14 = vmul.f32 %v4256_v23, %v4208_v22  ;;  %v523_v12 = vpop.xlane.xlu1 %522 }
 0x1ff   :  { %v1666_v25 = vmul.f32 %v3620_v35, %v1599_v50  ;;  %1863 = vrsqrt.f32 %v4254_v36  ;;  %vm1465_vm10 = vweird.f32 %v4221_v60  ;;  %v4271_v48 = vadd.f32 1e-05, %v836_v41 }
 0x200   :  { %v1462_v3 = vsub.f32 1.5, %v1461_v5  ;;  %v777_v39 = vsub.f32 %v649_v8, %v713_v63  ;;  %v4273_v4 = vpop.eup %1859  ;;  %vm1464_vm11 = vweird.f32 %v4170_v13  ;;  %v1450_v35 = vmul.f32 %v4256_v23, %v1449_v14  ;;  %v1940_v14 = vld [vmem:[%s4454_s0 + $0x1d0] sm:$0xff] }
 0x201   :  { %1730 = vst.msk [vmem:[%s4456_s2 + $0x190] sm:$0xff] %vm75_vm0, %v1666_v25  ;;  %vm1454_vm12 = vweird.f32 %v4208_v22  ;;  %v648_v18 = vmul.f32 0.020833334, %v514_v57  ;;  %v1439_v26 = vmul.f32 %v4273_v4, %v4225_v1  ;;  %vm1444_vm13 = vweird.f32 %v4225_v1  ;;  %vm1466_vm14 = vmor %vm1464_vm11, %vm1465_vm10  ;;  %v1939_v1 = vld [vmem:[%s4454_s0 + $0x1a8] sm:$0xff]  ;;  %v520_v25 = vpop.xlane.xlu0 %519 }
 0x202   :  { %v1463_v11 = vmul.f32 %v4221_v60, %v1462_v3  ;;  %1865 = vrsqrt.f32 %v4271_v48  ;;  %v1451_v13 = vmul.f32 0.5, %v1450_v35  ;;  %vm1455_vm15 = vweird.f32 %v4256_v23 }
 0x203   :  { %v4287_v42 = vpop.eup %1861  ;;  %v841_v56 = vmax.f32 %v777_v39, 0.0  ;;  %v776_v33 = vsub.f32 %v648_v18, %v712_v54  ;;  %v1440_v9 = vmul.f32 %v4273_v4, %v1439_v26  ;;  %vm1494_vm1 = vweird.f32 %v4242_v21  ;;  %vm1456_vm4 = vmor %vm1454_vm12, %vm1455_vm15 }
 0x204   :  { %v1467_v24 = vsel %vm1466_vm14, %v4221_v60, %v1463_v11  ;;  %v1489_v61 = vmul.f32 %v4287_v42, %v4242_v21  ;;  %v647_v51 = vmul.f32 0.020833334, %v511_v27  ;;  %v1452_v46 = vsub.f32 1.5, %v1451_v13 }
 0x205   :  { %v4297_v29 = vpop.eup %1863  ;;  %v1604_v10 = vmul.f32 %v1936_v49, %v1467_v24  ;;  %v4302_v58 = vadd.f32 1e-05, %v841_v56  ;;  %v840_v52 = vmax.f32 %v776_v33, 0.0  ;;  %v1441_v7 = vmul.f32 0.5, %v1440_v9 }
 0x206   :  { %v1490_v45 = vmul.f32 %v4287_v42, %v1489_v61  ;;  %v1479_v62 = vmul.f32 %v4297_v29, %v4254_v36  ;;  %vm1484_vm2 = vweird.f32 %v4254_v36  ;;  %v1453_v31 = vmul.f32 %v4256_v23, %v1452_v46  ;;  %v1941_v36 = vld [vmem:[%s4454_s0 + $0x1c8] sm:$0xff]  ;;  %v1942_v61 = vld [vmem:[%s4454_s0 + $0x1c0] sm:$0xff] }
 0x207   :  { %v1671_v53 = vmul.f32 %v4311_v40, %v1604_v10  ;;  %vm1445_vm3 = vweird.f32 %v4273_v4  ;;  %1867 = vrsqrt.f32 %v4302_v58  ;;  %v1442_v15 = vsub.f32 1.5, %v1441_v7 }
 0x208   :  { %v4317_v60 = vpop.eup %1865  ;;  %v1491_v19 = vmul.f32 0.5, %v1490_v45  ;;  %v1480_v37 = vmul.f32 %v4297_v29, %v1479_v62  ;;  %v4324_v17 = vadd.f32 1e-05, %v840_v52  ;;  %v1457_v34 = vsel %vm1456_vm4, %v4256_v23, %v1453_v31  ;;  %vm1446_vm6 = vmor %vm1444_vm13, %vm1445_vm3 }
 0x209   :  { %1735 = vst.msk [vmem:[%s4456_s2 + $0x1b8] sm:$0xff] %vm75_vm0, %v1671_v53  ;;  %vm1495_vm5 = vweird.f32 %v4287_v42  ;;  %v1469_v0 = vmul.f32 %v4317_v60, %v4271_v48  ;;  %v775_v22 = vsub.f32 %v647_v51, %v3544_v55  ;;  %v1603_v6 = vmul.f32 %v1938_v32, %v1457_v34 }
 0x20a   :  { %v1443_v43 = vmul.f32 %v4273_v4, %v1442_v15  ;;  %v1492_v59 = vsub.f32 1.5, %v1491_v19  ;;  %v1481_v38 = vmul.f32 0.5, %v1480_v37  ;;  %vm1485_vm7 = vweird.f32 %v4297_v29  ;;  %vm1496_vm8 = vmor %vm1494_vm1, %vm1495_vm5  ;;  %v1943_v15 = vld [vmem:[%s4454_s0 + $0x1e8] sm:$0xff] }
 0x20b   :  { %v1470_v47 = vmul.f32 %v4317_v60, %v1469_v0  ;;  %1869 = vrsqrt.f32 %v4324_v17  ;;  %v839_v55 = vmax.f32 %v775_v22, 0.0  ;;  %v1670_v20 = vmul.f32 %v4311_v40, %v1603_v6  ;;  %vm1486_vm10 = vmor %vm1484_vm2, %vm1485_vm7 }
 0x20c   :  { %v1447_v30 = vsel %vm1446_vm6, %v4273_v4, %v1443_v43  ;;  %v1493_v2 = vmul.f32 %v4287_v42, %v1492_v59  ;;  %v1482_v63 = vsub.f32 1.5, %v1481_v38  ;;  %v651_v5 = vmul.f32 0.020833334, %v523_v12  ;;  %v1944_v43 = vld [vmem:[%s4454_s0 + $0x1e0] sm:$0xff] }
 0x20d   :  { %v1868_v44 = vpop.eup %1867  ;;  %v1602_v50 = vmul.f32 %v1939_v1, %v1447_v30  ;;  %v1471_v23 = vmul.f32 0.5, %v1470_v47  ;;  %v4356_v54 = vadd.f32 1e-05, %v839_v55  ;;  %1734 = vst.msk [vmem:[%s4456_s2 + $0x1b0] sm:$0xff] %vm75_vm0, %v1670_v20  ;;  %vm1475_vm9 = vweird.f32 %v4317_v60 }
 0x20e   :  { %v1497_v41 = vsel %vm1496_vm8, %v4287_v42, %v1493_v2  ;;  %v1483_v8 = vmul.f32 %v4297_v29, %v1482_v63  ;;  %v1519_v57 = vmul.f32 %v1868_v44, %v4302_v58  ;;  %vm1474_vm11 = vweird.f32 %v4271_v48  ;;  %v1945_v2 = vld [vmem:[%s4454_s0 + $0x1d8] sm:$0xff] }
 0x20f   :  { %v1669_v21 = vmul.f32 %v4311_v40, %v1602_v50  ;;  %v1607_v3 = vmul.f32 %v1940_v14, %v1497_v41  ;;  %v1472_v39 = vsub.f32 1.5, %v1471_v23  ;;  %1871 = vrsqrt.f32 %v4356_v54  ;;  %vm1476_vm12 = vmor %vm1474_vm11, %vm1475_vm9 }
 0x210   :  { %v1487_v4 = vsel %vm1486_vm10, %v4297_v29, %v1483_v8  ;;  %v1520_v35 = vmul.f32 %v1868_v44, %v1519_v57  ;;  %v779_v18 = vsub.f32 %v651_v5, %v4264_v28  ;;  %v650_v13 = vmul.f32 0.020833334, %v520_v25  ;;  %v1946_v25 = vld [vmem:[%s4454_s0 + $0x1f8] sm:$0xff] }
 0x211   :  { %v1870_v27 = vpop.eup %1869  ;;  %1733 = vst.msk [vmem:[%s4456_s2 + $0x1a8] sm:$0xff] %vm75_vm0, %v1669_v21  ;;  %v1674_v11 = vmul.f32 %v4311_v40, %v1607_v3  ;;  %v1606_v26 = vmul.f32 %v1941_v36, %v1487_v4  ;;  %v1473_v42 = vmul.f32 %v4317_v60, %v1472_v39  ;;  %vm1525_vm13 = vweird.f32 %v1868_v44  ;;  %v1947_v39 = vld [vmem:[%s4454_s0 + $0x1f0] sm:$0xff] }
 0x212   :  { %v1521_v28 = vmul.f32 0.5, %v1520_v35  ;;  %v1509_v48 = vmul.f32 %v1870_v27, %v4324_v17  ;;  %v843_v56 = vmax.f32 %v779_v18, 0.0  ;;  %v778_v9 = vsub.f32 %v650_v13, %v4036_v16 }
 0x213   :  { %1738 = vst.msk [vmem:[%s4456_s2 + $0x1d0] sm:$0xff] %vm75_vm0, %v1674_v11  ;;  %v1673_v33 = vmul.f32 %v4311_v40, %v1606_v26  ;;  %v1477_v24 = vsel %vm1476_vm12, %v4317_v60, %v1473_v42  ;;  %vm1524_vm14 = vweird.f32 %v4302_v58  ;;  %vm1515_vm1 = vweird.f32 %v1870_v27 }
 0x214   :  { %v1605_v51 = vmul.f32 %v1942_v61, %v1477_v24  ;;  %v1522_v29 = vsub.f32 1.5, %v1521_v28  ;;  %v1510_v49 = vmul.f32 %v1870_v27, %v1509_v48  ;;  %v907_v10 = vadd.f32 1e-05, %v843_v56  ;;  %vm1526_vm15 = vmor %vm1524_vm14, %vm1525_vm13 }
 0x215   :  { %v1872_v46 = vpop.eup %1871  ;;  %1737 = vst.msk [vmem:[%s4456_s2 + $0x1c8] sm:$0xff] %vm75_vm0, %v1673_v33  ;;  %v842_v52 = vmax.f32 %v778_v9, 0.0  ;;  %vm1514_vm2 = vweird.f32 %v4324_v17  ;;  %vm1504_vm5 = vweird.f32 %v4356_v54 }
 0x216   :  { %v1672_v7 = vmul.f32 %v4311_v40, %v1605_v51  ;;  %v1523_v16 = vmul.f32 %v1868_v44, %v1522_v29  ;;  %v1511_v45 = vmul.f32 0.5, %v1510_v49  ;;  %v1499_v62 = vmul.f32 %v1872_v46, %v4356_v54  ;;  %vm1516_vm3 = vmor %vm1514_vm2, %vm1515_vm1 }
 0x217   :  { %1873 = vrsqrt.f32 %v907_v10  ;;  %v906_v53 = vadd.f32 1e-05, %v842_v52  ;;  %vm1505_vm4 = vweird.f32 %v1872_v46  ;;  %vm1544_vm8 = vweird.f32 %v907_v10 }
 0x218   :  { %1736 = vst.msk [vmem:[%s4456_s2 + $0x1c0] sm:$0xff] %vm75_vm0, %v1672_v7  ;;  %v1527_v31 = vsel %vm1526_vm15, %v1868_v44, %v1523_v16  ;;  %v1512_v60 = vsub.f32 1.5, %v1511_v45  ;;  %v1500_v58 = vmul.f32 %v1872_v46, %v1499_v62  ;;  %vm1506_vm6 = vmor %vm1504_vm5, %vm1505_vm4 }
 0x219   :  { %v1610_v19 = vmul.f32 %v1943_v15, %v1527_v31  ;;  %1875 = vrsqrt.f32 %v906_v53  ;;  %vm1534_vm11 = vweird.f32 %v906_v53 }
 0x21a   :  { %v1513_v37 = vmul.f32 %v1870_v27, %v1512_v60  ;;  %v1501_v34 = vmul.f32 0.5, %v1500_v58 }
 0x21b   :  { %v1677_v0 = vmul.f32 %v4311_v40, %v1610_v19 }
 0x21c   :  { %v1517_v22 = vsel %vm1516_vm3, %v1870_v27, %v1513_v37  ;;  %v1502_v32 = vsub.f32 1.5, %v1501_v34 }
 0x21d   :  { %v1874_v6 = vpop.eup %1873  ;;  %1741 = vst.msk [vmem:[%s4456_s2 + $0x1e8] sm:$0xff] %vm75_vm0, %v1677_v0  ;;  %v1609_v59 = vmul.f32 %v1944_v43, %v1517_v22 }
 0x21e   :  { %v1503_v38 = vmul.f32 %v1872_v46, %v1502_v32  ;;  %v1539_v17 = vmul.f32 %v1874_v6, %v907_v10  ;;  %vm1545_vm7 = vweird.f32 %v1874_v6 }
 0x21f   :  { %v1876_v12 = vpop.eup %1875  ;;  %v1676_v47 = vmul.f32 %v4311_v40, %v1609_v59  ;;  %vm1546_vm10 = vmor %vm1544_vm8, %vm1545_vm7 }
 0x220   :  { %v1507_v55 = vsel %vm1506_vm6, %v1872_v46, %v1503_v38  ;;  %v1540_v20 = vmul.f32 %v1874_v6, %v1539_v17  ;;  %v1529_v30 = vmul.f32 %v1876_v12, %v906_v53  ;;  %vm1535_vm9 = vweird.f32 %v1876_v12 }
 0x221   :  { %1740 = vst.msk [vmem:[%s4456_s2 + $0x1e0] sm:$0xff] %vm75_vm0, %v1676_v47  ;;  %v1608_v63 = vmul.f32 %v1945_v2, %v1507_v55  ;;  %vm1536_vm12 = vmor %vm1534_vm11, %vm1535_vm9 }
 0x222   :  { %v1541_v44 = vmul.f32 0.5, %v1540_v20  ;;  %v1530_v1 = vmul.f32 %v1876_v12, %v1529_v30 }
 0x223   :  { %v1675_v50 = vmul.f32 %v4311_v40, %v1608_v63 }
 0x224   :  { %v1542_v23 = vsub.f32 1.5, %v1541_v44  ;;  %v1531_v54 = vmul.f32 0.5, %v1530_v1 }
 0x225   :  { %1739 = vst.msk [vmem:[%s4456_s2 + $0x1d8] sm:$0xff] %vm75_vm0, %v1675_v50 }
 0x226   :  { %v1543_v5 = vmul.f32 %v1874_v6, %v1542_v23  ;;  %v1532_v41 = vsub.f32 1.5, %v1531_v54 }
 0x228   :  { %v1547_v8 = vsel %vm1546_vm10, %v1874_v6, %v1543_v5  ;;  %v1533_v57 = vmul.f32 %v1876_v12, %v1532_v41 }
 0x229   :  { %v1612_v21 = vmul.f32 %v1946_v25, %v1547_v8 }
 0x22a   :  { %v1537_v14 = vsel %vm1536_vm12, %v1876_v12, %v1533_v57 }
 0x22b   :  { %v1679_v3 = vmul.f32 %v4311_v40, %v1612_v21  ;;  %v1611_v4 = vmul.f32 %v1947_v39, %v1537_v14 }
 0x22d   :  { %1743 = vst.msk [vmem:[%s4456_s2 + $0x1f8] sm:$0xff] %vm75_vm0, %v1679_v3  ;;  %v1678_v35 = vmul.f32 %v4311_v40, %v1611_v4 }
 0x22f   :  { %1742 = vst.msk [vmem:[%s4456_s2 + $0x1f0] sm:$0xff] %vm75_vm0, %v1678_v35 }

</bundles_post_ra>
